<compile_context>
chip_gen: v7x
topology: tpu7x:2x2x1
jax: 0.10.0
libtpu: 0.0.40
codegen_flags: <defaults>
</compile_context>

<pallas_src>
import functools

import jax
import jax.numpy as jnp
from jax import lax
from jax.experimental import pallas as pl
from jax.experimental.pallas import tpu as pltpu


def _round_up(v, m):
    return -(-v // m) * m


def _mean3px_pad_kernel(x_ref, o_ref, *, p, H, W, C, P, TB):
    """One batch block. x_ref: (TB, C*H, W); o_ref: (TB, C*Hp, Wp)."""
    Hp = H + 2 * p
    Wp = W + 2 * p
    PP = P * P
    odt = o_ref.dtype
    f32 = jnp.float32
    inv3 = f32(1.0 / 3.0)

    # ---- patch-grid masks, value-side (VALU is idle in this kernel).
    # TB % P**2 == 0 and blocks start on P**2 boundaries, so the in-block
    # patch-grid position is simply (in-block index) % P**2.
    bpos = lax.broadcasted_iota(jnp.int32, (TB, 1, Wp), 0) % PP
    col = lax.broadcasted_iota(jnp.int32, (TB, 1, Wp), 2)
    is_top = bpos < P
    is_bot = bpos >= PP - P
    is_left = (bpos % P) == 0
    is_right = (bpos % P) == (P - 1)
    keep_lr = jnp.logical_not((is_left & (col < p)) |
                              (is_right & (col >= W + p)))        # (TB,1,Wp)
    keep_top = jnp.logical_not(is_top) & keep_lr                  # (TB,1,Wp)
    if p > 1:
        # PyTorch quirk: only the single padded row H+p is zeroed at the bottom.
        brow = lax.broadcasted_iota(jnp.int32, (1, p, 1), 1)
        keep_bot = jnp.logical_not(is_bot & (brow == 0)) & keep_lr  # (TB,p,Wp)
    else:
        keep_bot = jnp.logical_not(is_bot) & keep_lr              # (TB,1,Wp)

    zero_o = jnp.zeros((), odt)
    zero_f = f32(0.0)
    # hoisted zero pads, reused by every 1x3 mean (top & bottom, all channels)
    zpad1 = jnp.zeros((TB, p, 1), f32)
    zpad2 = jnp.zeros((TB, p, 2), f32)

    def mean3_zero_right(rows):                 # rows: (TB, p, W) float32
        s1 = jnp.concatenate([rows[..., 1:], zpad1], axis=-1)
        s2 = jnp.concatenate([rows[..., 2:], zpad2], axis=-1)
        return (rows + s1 + s2) * inv3

    for c in range(C):
        r0 = c * H                               # channel offset, folded input
        o0 = c * Hp                              # channel offset, folded output

        # ---- middle rows: [left-mean | interior copy | right-mean], full Wp --
        xin = x_ref[:, r0:r0 + H, :]                                 # (TB,H,W)
        l3 = xin[:, :, 0:3].astype(f32)
        r3 = xin[:, :, W - 3:W].astype(f32)
        lmean = ((l3[..., 0:1] + l3[..., 1:2] + l3[..., 2:3]) * inv3).astype(odt)
        rmean = ((r3[..., 0:1] + r3[..., 1:2] + r3[..., 2:3]) * inv3).astype(odt)
        mid = jnp.concatenate(
            [jnp.broadcast_to(lmean, (TB, H, p)), xin,
             jnp.broadcast_to(rmean, (TB, H, p))], axis=-1)          # (TB,H,Wp)
        o_ref[:, o0 + p:o0 + p + H, :] = jnp.where(keep_lr, mid, zero_o)

        # ---- top padding rows: [TL corner | 1x3 mean | TR corner], masked ----
        tsrc = x_ref[:, r0:r0 + p, :].astype(f32)                    # (TB,p,W)
        tl = jnp.broadcast_to(tsrc[:, 0:1, 0:1], (TB, p, p))
        tr = jnp.broadcast_to(tsrc[:, 0:1, W - 1:W], (TB, p, p))
        top = jnp.concatenate([tl, mean3_zero_right(tsrc), tr], axis=-1)
        o_ref[:, o0:o0 + p, :] = jnp.where(keep_top, top, zero_f).astype(odt)

        # ---- bottom padding rows: [BL corner | 1x3 mean | BR corner] ----
        bsrc = x_ref[:, r0 + H - p:r0 + H, :].astype(f32)            # (TB,p,W)
        bl = jnp.broadcast_to(bsrc[:, p - 1:p, 0:1], (TB, p, p))
        br = jnp.broadcast_to(bsrc[:, p - 1:p, W - 1:W], (TB, p, p))
        bot = jnp.concatenate([bl, mean3_zero_right(bsrc), br], axis=-1)
        o_ref[:, o0 + p + H:o0 + Hp, :] = (
            jnp.where(keep_bot, bot, zero_f).astype(odt))


def mean_3px_pad2d(x, padding, num_patches):
    b, C, H, W = x.shape
    p = int(padding)
    P = int(num_patches)
    Hp, Wp = H + 2 * p, W + 2 * p
    PP = P * P
    if p < 1:
        raise ValueError("padding must be >= 1")
    if W < 3:
        raise ValueError("W must be >= 3 for the 3-pixel means")
    if H < p or W < p:
        raise ValueError("spatial dims must be >= padding")
    if b % PP != 0:
        raise ValueError("batch must be a multiple of num_patches**2")

    # --- VMEM budgeting with the real (sublane, 128)-tiled footprint ---
    itemsize = jnp.dtype(x.dtype).itemsize
    sublane = max(8, 32 // itemsize)                 # 8 f32, 16 bf16, 32 int8
    in_pb = _round_up(C * H, sublane) * _round_up(W, 128) * itemsize
    out_pb = _round_up(C * Hp, sublane) * _round_up(Wp, 128) * itemsize
    per_b = in_pb + out_pb                           # padded VMEM bytes / batch

    try:                                             # generation-aware cap
        cap = int(pltpu.get_tpu_info().vmem_capacity_bytes)
        if cap <= 0:
            cap = 64 * 1024 * 1024
    except Exception:                                # conservative: v7x per-core
        cap = 64 * 1024 * 1024
    vmem_limit = max(16 << 20, min(cap * 3 // 4, 96 << 20))

    # --- batch tile: multiple of P**2 (static patch-grid masks), big enough
    #     for efficient DMA, small enough for double-buffering + f32 temps,
    #     and leaving >= min(groups, 4) grid steps for pipelining / 2 TCs ---
    groups = b // PP
    min_steps = min(groups, 4)
    max_m = max(1, groups // min_steps)
    tile_budget = min(vmem_limit // 6, 2 * 1024 * 1024)
    m = 1
    for d in range(1, min(max_m, 1024) + 1):
        if groups % d == 0 and d * PP * per_b <= tile_budget:
            m = d
    TB = m * PP
    block_bytes = TB * per_b
    # Never exceed ~90% of physical VMEM, but always cover the minimal block.
    vmem_limit = int(min(cap * 9 // 10, max(vmem_limit, 6 * block_bytes)))

    kernel = functools.partial(
        _mean3px_pad_kernel, p=p, H=H, W=W, C=C, P=P, TB=TB)
    out2 = pl.pallas_call(
        kernel,
        out_shape=jax.ShapeDtypeStruct((b, C * Hp, Wp), x.dtype),
        grid=(b // TB,),
        in_specs=[pl.BlockSpec((TB, C * H, W), lambda i: (i, 0, 0))],
        out_specs=pl.BlockSpec((TB, C * Hp, Wp), lambda i: (i, 0, 0)),
        compiler_params=pltpu.CompilerParams(
            dimension_semantics=("parallel",),
            vmem_limit_bytes=vmem_limit),
    )(x.reshape(b, C * H, W))
    return out2.reshape(b, C, Hp, Wp)


def mean_3px_pad2d_reference(x, padding, num_patches):
    """Pure-JAX reference mirroring the PyTorch forward, for verification."""
    b, C, H, W = x.shape
    p = int(padding)
    P = int(num_patches)

    def mean3_right_zero(rows):
        z = jnp.zeros(rows.shape[:-1] + (2,), rows.dtype)
        rp = jnp.concatenate([rows, z], axis=-1)
        return (rp[..., 0:W] + rp[..., 1:W + 1] + rp[..., 2:W + 2]) / 3.0

    top_pad = mean3_right_zero(x[:, :, :p, :])
    bot_pad = mean3_right_zero(x[:, :, H - p:, :])
    left_pad = jnp.mean(x[:, :, :, 0:3], axis=-1, keepdims=True)
    right_pad = jnp.mean(x[:, :, :, W - 3:W], axis=-1, keepdims=True)

    out = jnp.pad(x, ((0, 0), (0, 0), (p, p), (p, p)), mode='edge')
    out = out.at[:, :, :p, p:W + p].set(top_pad)
    out = out.at[:, :, H + p:, p:W + p].set(bot_pad)
    out = out.at[:, :, p:H + p, :p].set(jnp.broadcast_to(left_pad, (b, C, H, p)))
    out = out.at[:, :, p:H + p, W + p:].set(jnp.broadcast_to(right_pad, (b, C, H, p)))

    idx = jnp.arange(b)
    within = idx % (P * P)
    is_top = (within < P)[:, None, None, None]
    is_bot = (within >= P * P - P)[:, None, None, None]
    is_left = ((idx % P) == 0)[:, None, None, None]
    is_right = ((idx % P) == P - 1)[:, None, None, None]
    r = jnp.arange(H + 2 * p)[None, None, :, None]
    c = jnp.arange(W + 2 * p)[None, None, None, :]
    mask = ((is_top & (r < p)) | (is_bot & (r == H + p))
            | (is_left & (c < p)) | (is_right & (c >= W + p)))
    return jnp.where(mask, 0.0, out)


if __name__ == "__main__":
    padding = 1
    num_patches = 2          # P
    B_images = 2             # b = B * P**2
    b = B_images * num_patches ** 2
    C, H, W = 4, 16, 16

    key = jax.random.PRNGKey(0)
    x = jax.random.normal(key, (b, C, H, W), dtype=jnp.float32)

    out = mean_3px_pad2d(x, padding, num_patches)
    out = jax.block_until_ready(out)

    ref = mean_3px_pad2d_reference(x, padding, num_patches)
    assert out.shape == (b, C, H + 2 * padding, W + 2 * padding)
    assert jnp.allclose(out, ref, atol=1e-5, rtol=1e-5)

    print("KERNEL_OK")
</pallas_src>

<mosaic_0001>
module attributes {stable_mosaic.version = 11 : i64} {
  func.func @_mean3px_pad_kernel(%arg0: i32, %arg1: memref<4x64x16xf32, #tpu.memory_space<vmem>>, %arg2: memref<4x72x18xf32, #tpu.memory_space<vmem>>) attributes {dimension_semantics = [#tpu.dimension_semantics<parallel>], iteration_bounds = array<i64: 2>, scalar_prefetch = 0 : i64, scratch_operands = 0 : i64, tpu.core_type = #tpu.core_type<tc>, window_params = [{transform_indices = @transform_0, window_bounds = array<i64: 4, 64, 16>}, {transform_indices = @transform_1, window_bounds = array<i64: 4, 72, 18>}]} {
    %0 = tpu.iota {dimensions = array<i32: 0>} : vector<4x1x18xi32>
    %c4_i32 = arith.constant 4 : i32
    %c0_i32 = arith.constant 0 : i32
    %1 = arith.cmpi eq, %c4_i32, %c0_i32 : i32
    %c1_i32 = arith.constant 1 : i32
    %2 = arith.select %1, %c1_i32, %c4_i32 : i32
    %3 = vector.broadcast %2 : i32 to vector<4x1x18xi32>
    %4 = arith.remsi %0, %3 : vector<4x1x18xi32>
    %c0_i32_0 = arith.constant 0 : i32
    %5 = vector.broadcast %c0_i32_0 : i32 to vector<4x1x18xi32>
    %6 = arith.cmpi ne, %4, %5 : vector<4x1x18xi32>
    %c0_i32_1 = arith.constant 0 : i32
    %7 = vector.broadcast %c0_i32_1 : i32 to vector<4x1x18xi32>
    %8 = arith.cmpi slt, %4, %7 : vector<4x1x18xi32>
    %c0_i32_2 = arith.constant 0 : i32
    %9 = arith.cmpi slt, %2, %c0_i32_2 : i32
    %10 = vector.broadcast %9 : i1 to vector<4x1x18xi1>
    %11 = vector.broadcast %10 : vector<4x1x18xi1> to vector<4x1x18xi1>
    %12 = arith.xori %8, %11 : vector<4x1x18xi1>
    %13 = arith.andi %12, %6 : vector<4x1x18xi1>
    %14 = vector.broadcast %2 : i32 to vector<4x1x18xi32>
    %15 = arith.addi %4, %14 : vector<4x1x18xi32>
    %16 = arith.select %13, %15, %4 : vector<4x1x18xi1>, vector<4x1x18xi32>
    %17 = tpu.iota {dimensions = array<i32: 2>} : vector<4x1x18xi32>
    %c2_i32 = arith.constant 2 : i32
    %18 = vector.broadcast %c2_i32 : i32 to vector<4x1x18xi32>
    %19 = arith.cmpi slt, %16, %18 : vector<4x1x18xi32>
    %c2_i32_3 = arith.constant 2 : i32
    %20 = vector.broadcast %c2_i32_3 : i32 to vector<4x1x18xi32>
    %21 = arith.cmpi sge, %16, %20 : vector<4x1x18xi32>
    %c2_i32_4 = arith.constant 2 : i32
    %c0_i32_5 = arith.constant 0 : i32
    %22 = arith.cmpi eq, %c2_i32_4, %c0_i32_5 : i32
    %c1_i32_6 = arith.constant 1 : i32
    %23 = arith.select %22, %c1_i32_6, %c2_i32_4 : i32
    %24 = vector.broadcast %23 : i32 to vector<4x1x18xi32>
    %25 = arith.remsi %16, %24 : vector<4x1x18xi32>
    %c0_i32_7 = arith.constant 0 : i32
    %26 = vector.broadcast %c0_i32_7 : i32 to vector<4x1x18xi32>
    %27 = arith.cmpi ne, %25, %26 : vector<4x1x18xi32>
    %c0_i32_8 = arith.constant 0 : i32
    %28 = vector.broadcast %c0_i32_8 : i32 to vector<4x1x18xi32>
    %29 = arith.cmpi slt, %25, %28 : vector<4x1x18xi32>
    %c0_i32_9 = arith.constant 0 : i32
    %30 = arith.cmpi slt, %23, %c0_i32_9 : i32
    %31 = vector.broadcast %30 : i1 to vector<4x1x18xi1>
    %32 = vector.broadcast %31 : vector<4x1x18xi1> to vector<4x1x18xi1>
    %33 = arith.xori %29, %32 : vector<4x1x18xi1>
    %34 = arith.andi %33, %27 : vector<4x1x18xi1>
    %35 = vector.broadcast %23 : i32 to vector<4x1x18xi32>
    %36 = arith.addi %25, %35 : vector<4x1x18xi32>
    %37 = arith.select %34, %36, %25 : vector<4x1x18xi1>, vector<4x1x18xi32>
    %c0_i32_10 = arith.constant 0 : i32
    %38 = vector.broadcast %c0_i32_10 : i32 to vector<4x1x18xi32>
    %39 = arith.cmpi eq, %37, %38 : vector<4x1x18xi32>
    %c2_i32_11 = arith.constant 2 : i32
    %c0_i32_12 = arith.constant 0 : i32
    %40 = arith.cmpi eq, %c2_i32_11, %c0_i32_12 : i32
    %c1_i32_13 = arith.constant 1 : i32
    %41 = arith.select %40, %c1_i32_13, %c2_i32_11 : i32
    %42 = vector.broadcast %41 : i32 to vector<4x1x18xi32>
    %43 = arith.remsi %16, %42 : vector<4x1x18xi32>
    %c0_i32_14 = arith.constant 0 : i32
    %44 = vector.broadcast %c0_i32_14 : i32 to vector<4x1x18xi32>
    %45 = arith.cmpi ne, %43, %44 : vector<4x1x18xi32>
    %c0_i32_15 = arith.constant 0 : i32
    %46 = vector.broadcast %c0_i32_15 : i32 to vector<4x1x18xi32>
    %47 = arith.cmpi slt, %43, %46 : vector<4x1x18xi32>
    %c0_i32_16 = arith.constant 0 : i32
    %48 = arith.cmpi slt, %41, %c0_i32_16 : i32
    %49 = vector.broadcast %48 : i1 to vector<4x1x18xi1>
    %50 = vector.broadcast %49 : vector<4x1x18xi1> to vector<4x1x18xi1>
    %51 = arith.xori %47, %50 : vector<4x1x18xi1>
    %52 = arith.andi %51, %45 : vector<4x1x18xi1>
    %53 = vector.broadcast %41 : i32 to vector<4x1x18xi32>
    %54 = arith.addi %43, %53 : vector<4x1x18xi32>
    %55 = arith.select %52, %54, %43 : vector<4x1x18xi1>, vector<4x1x18xi32>
    %c1_i32_17 = arith.constant 1 : i32
    %56 = vector.broadcast %c1_i32_17 : i32 to vector<4x1x18xi32>
    %57 = arith.cmpi eq, %55, %56 : vector<4x1x18xi32>
    %c1_i32_18 = arith.constant 1 : i32
    %58 = vector.broadcast %c1_i32_18 : i32 to vector<4x1x18xi32>
    %59 = arith.cmpi slt, %17, %58 : vector<4x1x18xi32>
    %60 = arith.andi %39, %59 : vector<4x1x18xi1>
    %c17_i32 = arith.constant 17 : i32
    %61 = vector.broadcast %c17_i32 : i32 to vector<4x1x18xi32>
    %62 = arith.cmpi sge, %17, %61 : vector<4x1x18xi32>
    %63 = arith.andi %57, %62 : vector<4x1x18xi1>
    %64 = arith.ori %60, %63 : vector<4x1x18xi1>
    %cst = arith.constant dense<true> : vector<4x1x18xi1>
    %65 = arith.xori %64, %cst : vector<4x1x18xi1>
    %cst_19 = arith.constant dense<true> : vector<4x1x18xi1>
    %66 = arith.xori %19, %cst_19 : vector<4x1x18xi1>
    %67 = arith.andi %66, %65 : vector<4x1x18xi1>
    %cst_20 = arith.constant dense<true> : vector<4x1x18xi1>
    %68 = arith.xori %21, %cst_20 : vector<4x1x18xi1>
    %69 = arith.andi %68, %65 : vector<4x1x18xi1>
    %cst_21 = arith.constant 0.000000e+00 : f32
    %70 = vector.broadcast %cst_21 : f32 to vector<4x1x1xf32>
    %cst_22 = arith.constant 0.000000e+00 : f32
    %71 = vector.broadcast %cst_22 : f32 to vector<4x1x2xf32>
    %c0 = arith.constant 0 : index
    %c0_23 = arith.constant 0 : index
    %c0_24 = arith.constant 0 : index
    %72 = vector.load %arg1[%c0, %c0_23, %c0_24] : memref<4x64x16xf32, #tpu.memory_space<vmem>>, vector<4x16x16xf32>
    %73 = vector.extract_strided_slice %72 {offsets = [0, 0, 0], sizes = [4, 16, 3], strides = [1, 1, 1]} : vector<4x16x16xf32> to vector<4x16x3xf32>
    %74 = vector.extract_strided_slice %72 {offsets = [0, 0, 13], sizes = [4, 16, 3], strides = [1, 1, 1]} : vector<4x16x16xf32> to vector<4x16x3xf32>
    %75 = vector.extract_strided_slice %73 {offsets = [0, 0, 0], sizes = [4, 16, 1], strides = [1, 1, 1]} : vector<4x16x3xf32> to vector<4x16x1xf32>
    %76 = vector.extract_strided_slice %73 {offsets = [0, 0, 1], sizes = [4, 16, 1], strides = [1, 1, 1]} : vector<4x16x3xf32> to vector<4x16x1xf32>
    %77 = arith.addf %75, %76 : vector<4x16x1xf32>
    %78 = vector.extract_strided_slice %73 {offsets = [0, 0, 2], sizes = [4, 16, 1], strides = [1, 1, 1]} : vector<4x16x3xf32> to vector<4x16x1xf32>
    %79 = arith.addf %77, %78 : vector<4x16x1xf32>
    %cst_25 = arith.constant 0.333333343 : f32
    %80 = vector.broadcast %cst_25 : f32 to vector<4x16x1xf32>
    %81 = arith.mulf %79, %80 : vector<4x16x1xf32>
    %82 = vector.extract_strided_slice %74 {offsets = [0, 0, 0], sizes = [4, 16, 1], strides = [1, 1, 1]} : vector<4x16x3xf32> to vector<4x16x1xf32>
    %83 = vector.extract_strided_slice %74 {offsets = [0, 0, 1], sizes = [4, 16, 1], strides = [1, 1, 1]} : vector<4x16x3xf32> to vector<4x16x1xf32>
    %84 = arith.addf %82, %83 : vector<4x16x1xf32>
    %85 = vector.extract_strided_slice %74 {offsets = [0, 0, 2], sizes = [4, 16, 1], strides = [1, 1, 1]} : vector<4x16x3xf32> to vector<4x16x1xf32>
    %86 = arith.addf %84, %85 : vector<4x16x1xf32>
    %cst_26 = arith.constant 0.333333343 : f32
    %87 = vector.broadcast %cst_26 : f32 to vector<4x16x1xf32>
    %88 = arith.mulf %86, %87 : vector<4x16x1xf32>
    %89 = tpu.concatenate %81, %72, %88 in 2 : vector<4x16x1xf32>, vector<4x16x16xf32>, vector<4x16x1xf32> -> vector<4x16x18xf32>
    %cst_27 = arith.constant 0.000000e+00 : f32
    %90 = vector.shape_cast %65 : vector<4x1x18xi1> to vector<4x1x18xi1>
    %91 = vector.broadcast %90 : vector<4x1x18xi1> to vector<4x16x18xi1>
    %92 = vector.broadcast %cst_27 : f32 to vector<4x16x18xf32>
    %93 = arith.select %91, %89, %92 : vector<4x16x18xi1>, vector<4x16x18xf32>
    %c0_28 = arith.constant 0 : index
    %c1 = arith.constant 1 : index
    %c0_29 = arith.constant 0 : index
    %94 = vector.load %arg2[%c0_28, %c1, %c0_29] : memref<4x72x18xf32, #tpu.memory_space<vmem>>, vector<4x16x18xf32>
    tpu.vector_store %arg2[%c0_28, %c1, %c0_29], %93 {strides = array<i32>} : memref<4x72x18xf32, #tpu.memory_space<vmem>>, vector<4x16x18xf32>,
    %c0_30 = arith.constant 0 : index
    %c0_31 = arith.constant 0 : index
    %c0_32 = arith.constant 0 : index
    %95 = vector.load %arg1[%c0_30, %c0_31, %c0_32] : memref<4x64x16xf32, #tpu.memory_space<vmem>>, vector<4x1x16xf32>
    %96 = vector.extract_strided_slice %95 {offsets = [0, 0, 0], sizes = [4, 1, 1], strides = [1, 1, 1]} : vector<4x1x16xf32> to vector<4x1x1xf32>
    %97 = vector.extract_strided_slice %95 {offsets = [0, 0, 15], sizes = [4, 1, 1], strides = [1, 1, 1]} : vector<4x1x16xf32> to vector<4x1x1xf32>
    %98 = vector.extract_strided_slice %95 {offsets = [0, 0, 1], sizes = [4, 1, 15], strides = [1, 1, 1]} : vector<4x1x16xf32> to vector<4x1x15xf32>
    %99 = tpu.concatenate %98, %70 in 2 : vector<4x1x15xf32>, vector<4x1x1xf32> -> vector<4x1x16xf32>
    %100 = vector.extract_strided_slice %95 {offsets = [0, 0, 2], sizes = [4, 1, 14], strides = [1, 1, 1]} : vector<4x1x16xf32> to vector<4x1x14xf32>
    %101 = tpu.concatenate %100, %71 in 2 : vector<4x1x14xf32>, vector<4x1x2xf32> -> vector<4x1x16xf32>
    %102 = arith.addf %95, %99 : vector<4x1x16xf32>
    %103 = arith.addf %102, %101 : vector<4x1x16xf32>
    %cst_33 = arith.constant 0.333333343 : f32
    %104 = vector.broadcast %cst_33 : f32 to vector<4x1x16xf32>
    %105 = arith.mulf %103, %104 : vector<4x1x16xf32>
    %106 = tpu.concatenate %96, %105, %97 in 2 : vector<4x1x1xf32>, vector<4x1x16xf32>, vector<4x1x1xf32> -> vector<4x1x18xf32>
    %cst_34 = arith.constant 0.000000e+00 : f32
    %107 = vector.broadcast %cst_34 : f32 to vector<4x1x18xf32>
    %108 = arith.select %67, %106, %107 : vector<4x1x18xi1>, vector<4x1x18xf32>
    %c0_35 = arith.constant 0 : index
    %c0_36 = arith.constant 0 : index
    %c0_37 = arith.constant 0 : index
    %109 = vector.load %arg2[%c0_35, %c0_36, %c0_37] : memref<4x72x18xf32, #tpu.memory_space<vmem>>, vector<4x1x18xf32>
    tpu.vector_store %arg2[%c0_35, %c0_36, %c0_37], %108 {strides = array<i32>} : memref<4x72x18xf32, #tpu.memory_space<vmem>>, vector<4x1x18xf32>,
    %c0_38 = arith.constant 0 : index
    %c15 = arith.constant 15 : index
    %c0_39 = arith.constant 0 : index
    %110 = vector.load %arg1[%c0_38, %c15, %c0_39] : memref<4x64x16xf32, #tpu.memory_space<vmem>>, vector<4x1x16xf32>
    %111 = vector.extract_strided_slice %110 {offsets = [0, 0, 0], sizes = [4, 1, 1], strides = [1, 1, 1]} : vector<4x1x16xf32> to vector<4x1x1xf32>
    %112 = vector.extract_strided_slice %110 {offsets = [0, 0, 15], sizes = [4, 1, 1], strides = [1, 1, 1]} : vector<4x1x16xf32> to vector<4x1x1xf32>
    %113 = vector.extract_strided_slice %110 {offsets = [0, 0, 1], sizes = [4, 1, 15], strides = [1, 1, 1]} : vector<4x1x16xf32> to vector<4x1x15xf32>
    %114 = tpu.concatenate %113, %70 in 2 : vector<4x1x15xf32>, vector<4x1x1xf32> -> vector<4x1x16xf32>
    %115 = vector.extract_strided_slice %110 {offsets = [0, 0, 2], sizes = [4, 1, 14], strides = [1, 1, 1]} : vector<4x1x16xf32> to vector<4x1x14xf32>
    %116 = tpu.concatenate %115, %71 in 2 : vector<4x1x14xf32>, vector<4x1x2xf32> -> vector<4x1x16xf32>
    %117 = arith.addf %110, %114 : vector<4x1x16xf32>
    %118 = arith.addf %117, %116 : vector<4x1x16xf32>
    %cst_40 = arith.constant 0.333333343 : f32
    %119 = vector.broadcast %cst_40 : f32 to vector<4x1x16xf32>
    %120 = arith.mulf %118, %119 : vector<4x1x16xf32>
    %121 = tpu.concatenate %111, %120, %112 in 2 : vector<4x1x1xf32>, vector<4x1x16xf32>, vector<4x1x1xf32> -> vector<4x1x18xf32>
    %cst_41 = arith.constant 0.000000e+00 : f32
    %122 = vector.broadcast %cst_41 : f32 to vector<4x1x18xf32>
    %123 = arith.select %69, %121, %122 : vector<4x1x18xi1>, vector<4x1x18xf32>
    %c0_42 = arith.constant 0 : index
    %c17 = arith.constant 17 : index
    %c0_43 = arith.constant 0 : index
    %124 = vector.load %arg2[%c0_42, %c17, %c0_43] : memref<4x72x18xf32, #tpu.memory_space<vmem>>, vector<4x1x18xf32>
    tpu.vector_store %arg2[%c0_42, %c17, %c0_43], %123 {strides = array<i32>} : memref<4x72x18xf32, #tpu.memory_space<vmem>>, vector<4x1x18xf32>,
    %c0_44 = arith.constant 0 : index
    %c16 = arith.constant 16 : index
    %c0_45 = arith.constant 0 : index
    %125 = vector.load %arg1[%c0_44, %c16, %c0_45] : memref<4x64x16xf32, #tpu.memory_space<vmem>>, vector<4x16x16xf32>
    %126 = vector.extract_strided_slice %125 {offsets = [0, 0, 0], sizes = [4, 16, 3], strides = [1, 1, 1]} : vector<4x16x16xf32> to vector<4x16x3xf32>
    %127 = vector.extract_strided_slice %125 {offsets = [0, 0, 13], sizes = [4, 16, 3], strides = [1, 1, 1]} : vector<4x16x16xf32> to vector<4x16x3xf32>
    %128 = vector.extract_strided_slice %126 {offsets = [0, 0, 0], sizes = [4, 16, 1], strides = [1, 1, 1]} : vector<4x16x3xf32> to vector<4x16x1xf32>
    %129 = vector.extract_strided_slice %126 {offsets = [0, 0, 1], sizes = [4, 16, 1], strides = [1, 1, 1]} : vector<4x16x3xf32> to vector<4x16x1xf32>
    %130 = arith.addf %128, %129 : vector<4x16x1xf32>
    %131 = vector.extract_strided_slice %126 {offsets = [0, 0, 2], sizes = [4, 16, 1], strides = [1, 1, 1]} : vector<4x16x3xf32> to vector<4x16x1xf32>
    %132 = arith.addf %130, %131 : vector<4x16x1xf32>
    %cst_46 = arith.constant 0.333333343 : f32
    %133 = vector.broadcast %cst_46 : f32 to vector<4x16x1xf32>
    %134 = arith.mulf %132, %133 : vector<4x16x1xf32>
    %135 = vector.extract_strided_slice %127 {offsets = [0, 0, 0], sizes = [4, 16, 1], strides = [1, 1, 1]} : vector<4x16x3xf32> to vector<4x16x1xf32>
    %136 = vector.extract_strided_slice %127 {offsets = [0, 0, 1], sizes = [4, 16, 1], strides = [1, 1, 1]} : vector<4x16x3xf32> to vector<4x16x1xf32>
    %137 = arith.addf %135, %136 : vector<4x16x1xf32>
    %138 = vector.extract_strided_slice %127 {offsets = [0, 0, 2], sizes = [4, 16, 1], strides = [1, 1, 1]} : vector<4x16x3xf32> to vector<4x16x1xf32>
    %139 = arith.addf %137, %138 : vector<4x16x1xf32>
    %cst_47 = arith.constant 0.333333343 : f32
    %140 = vector.broadcast %cst_47 : f32 to vector<4x16x1xf32>
    %141 = arith.mulf %139, %140 : vector<4x16x1xf32>
    %142 = tpu.concatenate %134, %125, %141 in 2 : vector<4x16x1xf32>, vector<4x16x16xf32>, vector<4x16x1xf32> -> vector<4x16x18xf32>
    %cst_48 = arith.constant 0.000000e+00 : f32
    %143 = vector.shape_cast %65 : vector<4x1x18xi1> to vector<4x1x18xi1>
    %144 = vector.broadcast %143 : vector<4x1x18xi1> to vector<4x16x18xi1>
    %145 = vector.broadcast %cst_48 : f32 to vector<4x16x18xf32>
    %146 = arith.select %144, %142, %145 : vector<4x16x18xi1>, vector<4x16x18xf32>
    %c0_49 = arith.constant 0 : index
    %c19 = arith.constant 19 : index
    %c0_50 = arith.constant 0 : index
    %147 = vector.load %arg2[%c0_49, %c19, %c0_50] : memref<4x72x18xf32, #tpu.memory_space<vmem>>, vector<4x16x18xf32>
    tpu.vector_store %arg2[%c0_49, %c19, %c0_50], %146 {strides = array<i32>} : memref<4x72x18xf32, #tpu.memory_space<vmem>>, vector<4x16x18xf32>,
    %c0_51 = arith.constant 0 : index
    %c16_52 = arith.constant 16 : index
    %c0_53 = arith.constant 0 : index
    %148 = vector.load %arg1[%c0_51, %c16_52, %c0_53] : memref<4x64x16xf32, #tpu.memory_space<vmem>>, vector<4x1x16xf32>
    %149 = vector.extract_strided_slice %148 {offsets = [0, 0, 0], sizes = [4, 1, 1], strides = [1, 1, 1]} : vector<4x1x16xf32> to vector<4x1x1xf32>
    %150 = vector.extract_strided_slice %148 {offsets = [0, 0, 15], sizes = [4, 1, 1], strides = [1, 1, 1]} : vector<4x1x16xf32> to vector<4x1x1xf32>
    %151 = vector.extract_strided_slice %148 {offsets = [0, 0, 1], sizes = [4, 1, 15], strides = [1, 1, 1]} : vector<4x1x16xf32> to vector<4x1x15xf32>
    %152 = tpu.concatenate %151, %70 in 2 : vector<4x1x15xf32>, vector<4x1x1xf32> -> vector<4x1x16xf32>
    %153 = vector.extract_strided_slice %148 {offsets = [0, 0, 2], sizes = [4, 1, 14], strides = [1, 1, 1]} : vector<4x1x16xf32> to vector<4x1x14xf32>
    %154 = tpu.concatenate %153, %71 in 2 : vector<4x1x14xf32>, vector<4x1x2xf32> -> vector<4x1x16xf32>
    %155 = arith.addf %148, %152 : vector<4x1x16xf32>
    %156 = arith.addf %155, %154 : vector<4x1x16xf32>
    %cst_54 = arith.constant 0.333333343 : f32
    %157 = vector.broadcast %cst_54 : f32 to vector<4x1x16xf32>
    %158 = arith.mulf %156, %157 : vector<4x1x16xf32>
    %159 = tpu.concatenate %149, %158, %150 in 2 : vector<4x1x1xf32>, vector<4x1x16xf32>, vector<4x1x1xf32> -> vector<4x1x18xf32>
    %cst_55 = arith.constant 0.000000e+00 : f32
    %160 = vector.broadcast %cst_55 : f32 to vector<4x1x18xf32>
    %161 = arith.select %67, %159, %160 : vector<4x1x18xi1>, vector<4x1x18xf32>
    %c0_56 = arith.constant 0 : index
    %c18 = arith.constant 18 : index
    %c0_57 = arith.constant 0 : index
    %162 = vector.load %arg2[%c0_56, %c18, %c0_57] : memref<4x72x18xf32, #tpu.memory_space<vmem>>, vector<4x1x18xf32>
    tpu.vector_store %arg2[%c0_56, %c18, %c0_57], %161 {strides = array<i32>} : memref<4x72x18xf32, #tpu.memory_space<vmem>>, vector<4x1x18xf32>,
    %c0_58 = arith.constant 0 : index
    %c31 = arith.constant 31 : index
    %c0_59 = arith.constant 0 : index
    %163 = vector.load %arg1[%c0_58, %c31, %c0_59] : memref<4x64x16xf32, #tpu.memory_space<vmem>>, vector<4x1x16xf32>
    %164 = vector.extract_strided_slice %163 {offsets = [0, 0, 0], sizes = [4, 1, 1], strides = [1, 1, 1]} : vector<4x1x16xf32> to vector<4x1x1xf32>
    %165 = vector.extract_strided_slice %163 {offsets = [0, 0, 15], sizes = [4, 1, 1], strides = [1, 1, 1]} : vector<4x1x16xf32> to vector<4x1x1xf32>
    %166 = vector.extract_strided_slice %163 {offsets = [0, 0, 1], sizes = [4, 1, 15], strides = [1, 1, 1]} : vector<4x1x16xf32> to vector<4x1x15xf32>
    %167 = tpu.concatenate %166, %70 in 2 : vector<4x1x15xf32>, vector<4x1x1xf32> -> vector<4x1x16xf32>
    %168 = vector.extract_strided_slice %163 {offsets = [0, 0, 2], sizes = [4, 1, 14], strides = [1, 1, 1]} : vector<4x1x16xf32> to vector<4x1x14xf32>
    %169 = tpu.concatenate %168, %71 in 2 : vector<4x1x14xf32>, vector<4x1x2xf32> -> vector<4x1x16xf32>
    %170 = arith.addf %163, %167 : vector<4x1x16xf32>
    %171 = arith.addf %170, %169 : vector<4x1x16xf32>
    %cst_60 = arith.constant 0.333333343 : f32
    %172 = vector.broadcast %cst_60 : f32 to vector<4x1x16xf32>
    %173 = arith.mulf %171, %172 : vector<4x1x16xf32>
    %174 = tpu.concatenate %164, %173, %165 in 2 : vector<4x1x1xf32>, vector<4x1x16xf32>, vector<4x1x1xf32> -> vector<4x1x18xf32>
    %cst_61 = arith.constant 0.000000e+00 : f32
    %175 = vector.broadcast %cst_61 : f32 to vector<4x1x18xf32>
    %176 = arith.select %69, %174, %175 : vector<4x1x18xi1>, vector<4x1x18xf32>
    %c0_62 = arith.constant 0 : index
    %c35 = arith.constant 35 : index
    %c0_63 = arith.constant 0 : index
    %177 = vector.load %arg2[%c0_62, %c35, %c0_63] : memref<4x72x18xf32, #tpu.memory_space<vmem>>, vector<4x1x18xf32>
    tpu.vector_store %arg2[%c0_62, %c35, %c0_63], %176 {strides = array<i32>} : memref<4x72x18xf32, #tpu.memory_space<vmem>>, vector<4x1x18xf32>,
    %c0_64 = arith.constant 0 : index
    %c32 = arith.constant 32 : index
    %c0_65 = arith.constant 0 : index
    %178 = vector.load %arg1[%c0_64, %c32, %c0_65] : memref<4x64x16xf32, #tpu.memory_space<vmem>>, vector<4x16x16xf32>
    %179 = vector.extract_strided_slice %178 {offsets = [0, 0, 0], sizes = [4, 16, 3], strides = [1, 1, 1]} : vector<4x16x16xf32> to vector<4x16x3xf32>
    %180 = vector.extract_strided_slice %178 {offsets = [0, 0, 13], sizes = [4, 16, 3], strides = [1, 1, 1]} : vector<4x16x16xf32> to vector<4x16x3xf32>
    %181 = vector.extract_strided_slice %179 {offsets = [0, 0, 0], sizes = [4, 16, 1], strides = [1, 1, 1]} : vector<4x16x3xf32> to vector<4x16x1xf32>
    %182 = vector.extract_strided_slice %179 {offsets = [0, 0, 1], sizes = [4, 16, 1], strides = [1, 1, 1]} : vector<4x16x3xf32> to vector<4x16x1xf32>
    %183 = arith.addf %181, %182 : vector<4x16x1xf32>
    %184 = vector.extract_strided_slice %179 {offsets = [0, 0, 2], sizes = [4, 16, 1], strides = [1, 1, 1]} : vector<4x16x3xf32> to vector<4x16x1xf32>
    %185 = arith.addf %183, %184 : vector<4x16x1xf32>
    %cst_66 = arith.constant 0.333333343 : f32
    %186 = vector.broadcast %cst_66 : f32 to vector<4x16x1xf32>
    %187 = arith.mulf %185, %186 : vector<4x16x1xf32>
    %188 = vector.extract_strided_slice %180 {offsets = [0, 0, 0], sizes = [4, 16, 1], strides = [1, 1, 1]} : vector<4x16x3xf32> to vector<4x16x1xf32>
    %189 = vector.extract_strided_slice %180 {offsets = [0, 0, 1], sizes = [4, 16, 1], strides = [1, 1, 1]} : vector<4x16x3xf32> to vector<4x16x1xf32>
    %190 = arith.addf %188, %189 : vector<4x16x1xf32>
    %191 = vector.extract_strided_slice %180 {offsets = [0, 0, 2], sizes = [4, 16, 1], strides = [1, 1, 1]} : vector<4x16x3xf32> to vector<4x16x1xf32>
    %192 = arith.addf %190, %191 : vector<4x16x1xf32>
    %cst_67 = arith.constant 0.333333343 : f32
    %193 = vector.broadcast %cst_67 : f32 to vector<4x16x1xf32>
    %194 = arith.mulf %192, %193 : vector<4x16x1xf32>
    %195 = tpu.concatenate %187, %178, %194 in 2 : vector<4x16x1xf32>, vector<4x16x16xf32>, vector<4x16x1xf32> -> vector<4x16x18xf32>
    %cst_68 = arith.constant 0.000000e+00 : f32
    %196 = vector.shape_cast %65 : vector<4x1x18xi1> to vector<4x1x18xi1>
    %197 = vector.broadcast %196 : vector<4x1x18xi1> to vector<4x16x18xi1>
    %198 = vector.broadcast %cst_68 : f32 to vector<4x16x18xf32>
    %199 = arith.select %197, %195, %198 : vector<4x16x18xi1>, vector<4x16x18xf32>
    %c0_69 = arith.constant 0 : index
    %c37 = arith.constant 37 : index
    %c0_70 = arith.constant 0 : index
    %200 = vector.load %arg2[%c0_69, %c37, %c0_70] : memref<4x72x18xf32, #tpu.memory_space<vmem>>, vector<4x16x18xf32>
    tpu.vector_store %arg2[%c0_69, %c37, %c0_70], %199 {strides = array<i32>} : memref<4x72x18xf32, #tpu.memory_space<vmem>>, vector<4x16x18xf32>,
    %c0_71 = arith.constant 0 : index
    %c32_72 = arith.constant 32 : index
    %c0_73 = arith.constant 0 : index
    %201 = vector.load %arg1[%c0_71, %c32_72, %c0_73] : memref<4x64x16xf32, #tpu.memory_space<vmem>>, vector<4x1x16xf32>
    %202 = vector.extract_strided_slice %201 {offsets = [0, 0, 0], sizes = [4, 1, 1], strides = [1, 1, 1]} : vector<4x1x16xf32> to vector<4x1x1xf32>
    %203 = vector.extract_strided_slice %201 {offsets = [0, 0, 15], sizes = [4, 1, 1], strides = [1, 1, 1]} : vector<4x1x16xf32> to vector<4x1x1xf32>
    %204 = vector.extract_strided_slice %201 {offsets = [0, 0, 1], sizes = [4, 1, 15], strides = [1, 1, 1]} : vector<4x1x16xf32> to vector<4x1x15xf32>
    %205 = tpu.concatenate %204, %70 in 2 : vector<4x1x15xf32>, vector<4x1x1xf32> -> vector<4x1x16xf32>
    %206 = vector.extract_strided_slice %201 {offsets = [0, 0, 2], sizes = [4, 1, 14], strides = [1, 1, 1]} : vector<4x1x16xf32> to vector<4x1x14xf32>
    %207 = tpu.concatenate %206, %71 in 2 : vector<4x1x14xf32>, vector<4x1x2xf32> -> vector<4x1x16xf32>
    %208 = arith.addf %201, %205 : vector<4x1x16xf32>
    %209 = arith.addf %208, %207 : vector<4x1x16xf32>
    %cst_74 = arith.constant 0.333333343 : f32
    %210 = vector.broadcast %cst_74 : f32 to vector<4x1x16xf32>
    %211 = arith.mulf %209, %210 : vector<4x1x16xf32>
    %212 = tpu.concatenate %202, %211, %203 in 2 : vector<4x1x1xf32>, vector<4x1x16xf32>, vector<4x1x1xf32> -> vector<4x1x18xf32>
    %cst_75 = arith.constant 0.000000e+00 : f32
    %213 = vector.broadcast %cst_75 : f32 to vector<4x1x18xf32>
    %214 = arith.select %67, %212, %213 : vector<4x1x18xi1>, vector<4x1x18xf32>
    %c0_76 = arith.constant 0 : index
    %c36 = arith.constant 36 : index
    %c0_77 = arith.constant 0 : index
    %215 = vector.load %arg2[%c0_76, %c36, %c0_77] : memref<4x72x18xf32, #tpu.memory_space<vmem>>, vector<4x1x18xf32>
    tpu.vector_store %arg2[%c0_76, %c36, %c0_77], %214 {strides = array<i32>} : memref<4x72x18xf32, #tpu.memory_space<vmem>>, vector<4x1x18xf32>,
    %c0_78 = arith.constant 0 : index
    %c47 = arith.constant 47 : index
    %c0_79 = arith.constant 0 : index
    %216 = vector.load %arg1[%c0_78, %c47, %c0_79] : memref<4x64x16xf32, #tpu.memory_space<vmem>>, vector<4x1x16xf32>
    %217 = vector.extract_strided_slice %216 {offsets = [0, 0, 0], sizes = [4, 1, 1], strides = [1, 1, 1]} : vector<4x1x16xf32> to vector<4x1x1xf32>
    %218 = vector.extract_strided_slice %216 {offsets = [0, 0, 15], sizes = [4, 1, 1], strides = [1, 1, 1]} : vector<4x1x16xf32> to vector<4x1x1xf32>
    %219 = vector.extract_strided_slice %216 {offsets = [0, 0, 1], sizes = [4, 1, 15], strides = [1, 1, 1]} : vector<4x1x16xf32> to vector<4x1x15xf32>
    %220 = tpu.concatenate %219, %70 in 2 : vector<4x1x15xf32>, vector<4x1x1xf32> -> vector<4x1x16xf32>
    %221 = vector.extract_strided_slice %216 {offsets = [0, 0, 2], sizes = [4, 1, 14], strides = [1, 1, 1]} : vector<4x1x16xf32> to vector<4x1x14xf32>
    %222 = tpu.concatenate %221, %71 in 2 : vector<4x1x14xf32>, vector<4x1x2xf32> -> vector<4x1x16xf32>
    %223 = arith.addf %216, %220 : vector<4x1x16xf32>
    %224 = arith.addf %223, %222 : vector<4x1x16xf32>
    %cst_80 = arith.constant 0.333333343 : f32
    %225 = vector.broadcast %cst_80 : f32 to vector<4x1x16xf32>
    %226 = arith.mulf %224, %225 : vector<4x1x16xf32>
    %227 = tpu.concatenate %217, %226, %218 in 2 : vector<4x1x1xf32>, vector<4x1x16xf32>, vector<4x1x1xf32> -> vector<4x1x18xf32>
    %cst_81 = arith.constant 0.000000e+00 : f32
    %228 = vector.broadcast %cst_81 : f32 to vector<4x1x18xf32>
    %229 = arith.select %69, %227, %228 : vector<4x1x18xi1>, vector<4x1x18xf32>
    %c0_82 = arith.constant 0 : index
    %c53 = arith.constant 53 : index
    %c0_83 = arith.constant 0 : index
    %230 = vector.load %arg2[%c0_82, %c53, %c0_83] : memref<4x72x18xf32, #tpu.memory_space<vmem>>, vector<4x1x18xf32>
    tpu.vector_store %arg2[%c0_82, %c53, %c0_83], %229 {strides = array<i32>} : memref<4x72x18xf32, #tpu.memory_space<vmem>>, vector<4x1x18xf32>,
    %c0_84 = arith.constant 0 : index
    %c48 = arith.constant 48 : index
    %c0_85 = arith.constant 0 : index
    %231 = vector.load %arg1[%c0_84, %c48, %c0_85] : memref<4x64x16xf32, #tpu.memory_space<vmem>>, vector<4x16x16xf32>
    %232 = vector.extract_strided_slice %231 {offsets = [0, 0, 0], sizes = [4, 16, 3], strides = [1, 1, 1]} : vector<4x16x16xf32> to vector<4x16x3xf32>
    %233 = vector.extract_strided_slice %231 {offsets = [0, 0, 13], sizes = [4, 16, 3], strides = [1, 1, 1]} : vector<4x16x16xf32> to vector<4x16x3xf32>
    %234 = vector.extract_strided_slice %232 {offsets = [0, 0, 0], sizes = [4, 16, 1], strides = [1, 1, 1]} : vector<4x16x3xf32> to vector<4x16x1xf32>
    %235 = vector.extract_strided_slice %232 {offsets = [0, 0, 1], sizes = [4, 16, 1], strides = [1, 1, 1]} : vector<4x16x3xf32> to vector<4x16x1xf32>
    %236 = arith.addf %234, %235 : vector<4x16x1xf32>
    %237 = vector.extract_strided_slice %232 {offsets = [0, 0, 2], sizes = [4, 16, 1], strides = [1, 1, 1]} : vector<4x16x3xf32> to vector<4x16x1xf32>
    %238 = arith.addf %236, %237 : vector<4x16x1xf32>
    %cst_86 = arith.constant 0.333333343 : f32
    %239 = vector.broadcast %cst_86 : f32 to vector<4x16x1xf32>
    %240 = arith.mulf %238, %239 : vector<4x16x1xf32>
    %241 = vector.extract_strided_slice %233 {offsets = [0, 0, 0], sizes = [4, 16, 1], strides = [1, 1, 1]} : vector<4x16x3xf32> to vector<4x16x1xf32>
    %242 = vector.extract_strided_slice %233 {offsets = [0, 0, 1], sizes = [4, 16, 1], strides = [1, 1, 1]} : vector<4x16x3xf32> to vector<4x16x1xf32>
    %243 = arith.addf %241, %242 : vector<4x16x1xf32>
    %244 = vector.extract_strided_slice %233 {offsets = [0, 0, 2], sizes = [4, 16, 1], strides = [1, 1, 1]} : vector<4x16x3xf32> to vector<4x16x1xf32>
    %245 = arith.addf %243, %244 : vector<4x16x1xf32>
    %cst_87 = arith.constant 0.333333343 : f32
    %246 = vector.broadcast %cst_87 : f32 to vector<4x16x1xf32>
    %247 = arith.mulf %245, %246 : vector<4x16x1xf32>
    %248 = tpu.concatenate %240, %231, %247 in 2 : vector<4x16x1xf32>, vector<4x16x16xf32>, vector<4x16x1xf32> -> vector<4x16x18xf32>
    %cst_88 = arith.constant 0.000000e+00 : f32
    %249 = vector.shape_cast %65 : vector<4x1x18xi1> to vector<4x1x18xi1>
    %250 = vector.broadcast %249 : vector<4x1x18xi1> to vector<4x16x18xi1>
    %251 = vector.broadcast %cst_88 : f32 to vector<4x16x18xf32>
    %252 = arith.select %250, %248, %251 : vector<4x16x18xi1>, vector<4x16x18xf32>
    %c0_89 = arith.constant 0 : index
    %c55 = arith.constant 55 : index
    %c0_90 = arith.constant 0 : index
    %253 = vector.load %arg2[%c0_89, %c55, %c0_90] : memref<4x72x18xf32, #tpu.memory_space<vmem>>, vector<4x16x18xf32>
    tpu.vector_store %arg2[%c0_89, %c55, %c0_90], %252 {strides = array<i32>} : memref<4x72x18xf32, #tpu.memory_space<vmem>>, vector<4x16x18xf32>,
    %c0_91 = arith.constant 0 : index
    %c48_92 = arith.constant 48 : index
    %c0_93 = arith.constant 0 : index
    %254 = vector.load %arg1[%c0_91, %c48_92, %c0_93] : memref<4x64x16xf32, #tpu.memory_space<vmem>>, vector<4x1x16xf32>
    %255 = vector.extract_strided_slice %254 {offsets = [0, 0, 0], sizes = [4, 1, 1], strides = [1, 1, 1]} : vector<4x1x16xf32> to vector<4x1x1xf32>
    %256 = vector.extract_strided_slice %254 {offsets = [0, 0, 15], sizes = [4, 1, 1], strides = [1, 1, 1]} : vector<4x1x16xf32> to vector<4x1x1xf32>
    %257 = vector.extract_strided_slice %254 {offsets = [0, 0, 1], sizes = [4, 1, 15], strides = [1, 1, 1]} : vector<4x1x16xf32> to vector<4x1x15xf32>
    %258 = tpu.concatenate %257, %70 in 2 : vector<4x1x15xf32>, vector<4x1x1xf32> -> vector<4x1x16xf32>
    %259 = vector.extract_strided_slice %254 {offsets = [0, 0, 2], sizes = [4, 1, 14], strides = [1, 1, 1]} : vector<4x1x16xf32> to vector<4x1x14xf32>
    %260 = tpu.concatenate %259, %71 in 2 : vector<4x1x14xf32>, vector<4x1x2xf32> -> vector<4x1x16xf32>
    %261 = arith.addf %254, %258 : vector<4x1x16xf32>
    %262 = arith.addf %261, %260 : vector<4x1x16xf32>
    %cst_94 = arith.constant 0.333333343 : f32
    %263 = vector.broadcast %cst_94 : f32 to vector<4x1x16xf32>
    %264 = arith.mulf %262, %263 : vector<4x1x16xf32>
    %265 = tpu.concatenate %255, %264, %256 in 2 : vector<4x1x1xf32>, vector<4x1x16xf32>, vector<4x1x1xf32> -> vector<4x1x18xf32>
    %cst_95 = arith.constant 0.000000e+00 : f32
    %266 = vector.broadcast %cst_95 : f32 to vector<4x1x18xf32>
    %267 = arith.select %67, %265, %266 : vector<4x1x18xi1>, vector<4x1x18xf32>
    %c0_96 = arith.constant 0 : index
    %c54 = arith.constant 54 : index
    %c0_97 = arith.constant 0 : index
    %268 = vector.load %arg2[%c0_96, %c54, %c0_97] : memref<4x72x18xf32, #tpu.memory_space<vmem>>, vector<4x1x18xf32>
    tpu.vector_store %arg2[%c0_96, %c54, %c0_97], %267 {strides = array<i32>} : memref<4x72x18xf32, #tpu.memory_space<vmem>>, vector<4x1x18xf32>,
    %c0_98 = arith.constant 0 : index
    %c63 = arith.constant 63 : index
    %c0_99 = arith.constant 0 : index
    %269 = vector.load %arg1[%c0_98, %c63, %c0_99] : memref<4x64x16xf32, #tpu.memory_space<vmem>>, vector<4x1x16xf32>
    %270 = vector.extract_strided_slice %269 {offsets = [0, 0, 0], sizes = [4, 1, 1], strides = [1, 1, 1]} : vector<4x1x16xf32> to vector<4x1x1xf32>
    %271 = vector.extract_strided_slice %269 {offsets = [0, 0, 15], sizes = [4, 1, 1], strides = [1, 1, 1]} : vector<4x1x16xf32> to vector<4x1x1xf32>
    %272 = vector.extract_strided_slice %269 {offsets = [0, 0, 1], sizes = [4, 1, 15], strides = [1, 1, 1]} : vector<4x1x16xf32> to vector<4x1x15xf32>
    %273 = tpu.concatenate %272, %70 in 2 : vector<4x1x15xf32>, vector<4x1x1xf32> -> vector<4x1x16xf32>
    %274 = vector.extract_strided_slice %269 {offsets = [0, 0, 2], sizes = [4, 1, 14], strides = [1, 1, 1]} : vector<4x1x16xf32> to vector<4x1x14xf32>
    %275 = tpu.concatenate %274, %71 in 2 : vector<4x1x14xf32>, vector<4x1x2xf32> -> vector<4x1x16xf32>
    %276 = arith.addf %269, %273 : vector<4x1x16xf32>
    %277 = arith.addf %276, %275 : vector<4x1x16xf32>
    %cst_100 = arith.constant 0.333333343 : f32
    %278 = vector.broadcast %cst_100 : f32 to vector<4x1x16xf32>
    %279 = arith.mulf %277, %278 : vector<4x1x16xf32>
    %280 = tpu.concatenate %270, %279, %271 in 2 : vector<4x1x1xf32>, vector<4x1x16xf32>, vector<4x1x1xf32> -> vector<4x1x18xf32>
    %cst_101 = arith.constant 0.000000e+00 : f32
    %281 = vector.broadcast %cst_101 : f32 to vector<4x1x18xf32>
    %282 = arith.select %69, %280, %281 : vector<4x1x18xi1>, vector<4x1x18xf32>
    %c0_102 = arith.constant 0 : index
    %c71 = arith.constant 71 : index
    %c0_103 = arith.constant 0 : index
    %283 = vector.load %arg2[%c0_102, %c71, %c0_103] : memref<4x72x18xf32, #tpu.memory_space<vmem>>, vector<4x1x18xf32>
    tpu.vector_store %arg2[%c0_102, %c71, %c0_103], %282 {strides = array<i32>} : memref<4x72x18xf32, #tpu.memory_space<vmem>>, vector<4x1x18xf32>,
    return
  }
  func.func @transform_0(%arg0: i32) -> (i32, i32, i32) {
    %c0_i32 = arith.constant 0 : i32
    %c0_i32_0 = arith.constant 0 : i32
    %c0_i32_1 = arith.constant 0 : i32
    return %arg0, %c0_i32, %c0_i32_0 : i32, i32, i32
  }
  func.func @transform_1(%arg0: i32) -> (i32, i32, i32) {
    %c0_i32 = arith.constant 0 : i32
    %c0_i32_0 = arith.constant 0 : i32
    %c0_i32_1 = arith.constant 0 : i32
    return %arg0, %c0_i32, %c0_i32_0 : i32, i32, i32
  }
}

</mosaic_0001>

<bundles_post_ra>
// kernel: tpu_custom_call.1
= control target key start
LH: loop header
LB: loop body
LE: loop exit
PB: predicated region body
PF: predicated region fallthrough
CT: control target
= control target key end

     0   :  { %s1735_s6 = smov 0   ;;  %s2814_s0 = inlined_call_operand.vmem [shape: f32[8,64,16], index: 0, kind: input, shape index: {}]   ;;  %s2815_s1 = inlined_call_operand.vmem [shape: f32[8,72,18], index: 1, kind: output, shape index: {}]  }
   0x1 LB: > { %s1681_s7 = sadd.s32 4294967295, %s1716_s6   ;;  %p1685_p0 = scmp.ge.s32.totalorder %s1716_s6, 1  ;;  %s1716_s6 = sphi %s1735_s6, %s11_s6  }
   0x2   : > { %p89_p1 = scmp.lt.s32.totalorder %s1716_s6, 3 }
   0x4   : > { %p90_p2 = pnand %p1685_p0, %p89_p1 }
   0x5   : > { %s1686_s8 = sshll.u32 (!%p90_p2), %s1681_s7, 2  ;;  %s1718_s13 = smov (!%p90_p2), 127   ;;  %vm418_vm0 = vcmask (!%p90_p2), 139264   ;;  %vm344_vm1 = vcmask (!%p90_p2), 121856   ;;  %vm361_vm2 = vcmask (!%p90_p2), 113664   ;;  %vm285_vm4 = vcmask (!%p90_p2), 7168  }
   0x6   : > { %93 = sbr.rel (%p90_p2) target bundleno = 977 (0x3d1), region = 24  ;;  %p112_p3 = scmp.lt.s32.totalorder (!%p90_p2), %s1686_s8, 7  ;;  %vm294_vm5 = vcmask (!%p90_p2), 138240   ;;  %vm1724_vm6 = vmmov (!%p90_p2), 1   ;;  %vm315_vm8 = vcmask (!%p90_p2), 146432  }
   0x7   : > { %s1719_s14 = smov (!%p90_p2), 126   ;;  %s1720_s15 = smov (!%p90_p2), 1  }
   0x8   : > { %s1721_s16 = smov (!%p90_p2), 2   ;;  %s1722_s17 = smov (!%p90_p2), 4  }
   0xd   : > { %s2821_s8 = smov (!%p112_p3, %s1686_s8), 7 }
   0xe   : > { %s1693_s9 = sshll.u32 %s2821_s8, 6  ;;  %s1694_s18 = smul.u32 72, %s2821_s8 }
   0xf   : > { %s1749_s12 = scalar_lea.vmem %s2814_s0, %s1693_s9 }
  0x10   : > { %v1752_v0 = vld [vmem:[%s1749_s12 + $0x40] sm:$0xff]  ;;  %v1762_v2 = vld [vmem:[%s1749_s12 + $0x48] sm:$0xff]  ;;  %v1860_v12 = vld [vmem:[%s1749_s12 + $0x18] sm:$0xff]  ;;  %s1979_s21 = scalar_lea.vmem %s2815_s1, %s1694_s18 }
  0x11   : > { %v1755_v1 = vld [vmem:[%s1749_s12] sm:$0xff]  ;;  %161 = vrot.lane.b32.xlu1 %v1752_v0, %s1718_s13  ;;  %v1765_v3 = vld [vmem:[%s1749_s12 + $0x8] sm:$0xff]  ;;  %v1863_v13 = vld [vmem:[%s1749_s12 + $0x10] sm:$0xff] }
  0x12   : > { %157 = vrot.lane.b32.xlu0 %v1755_v1, %s1718_s13  ;;  %v1772_v4 = vld [vmem:[%s1749_s12 + $0x88] sm:$0xff]  ;;  %v1775_v5 = vld [vmem:[%s1749_s12 + $0x80] sm:$0xff]  ;;  %v1870_v14 = vld [vmem:[%s1749_s12 + $0x58] sm:$0xff] }
  0x13   : > { %v1782_v6 = vld [vmem:[%s1749_s12 + $0xc8] sm:$0xff]  ;;  %v1785_v7 = vld [vmem:[%s1749_s12 + $0xc0] sm:$0xff]  ;;  %v1873_v15 = vld [vmem:[%s1749_s12 + $0x50] sm:$0xff] }
  0x14   : > { %v1824_v8 = vld [vmem:[%s1749_s12 + $0xc0] sm:$0x1]  ;;  %v1842_v10 = vld [vmem:[%s1749_s12 + $0x4f] sm:$0x1]  ;;  %v1880_v16 = vld [vmem:[%s1749_s12 + $0x98] sm:$0xff] }
  0x15   : > { %163 = vrot.lane.b32.xlu1 %v1762_v2, %s1718_s13  ;;  %v1827_v9 = vld [vmem:[%s1749_s12 + $0x80] sm:$0x1]  ;;  %v1845_v11 = vld [vmem:[%s1749_s12 + $0xf] sm:$0x1]  ;;  %v1883_v17 = vld [vmem:[%s1749_s12 + $0x90] sm:$0xff] }
  0x16   : > { %159 = vrot.lane.b32.xlu0 %v1765_v3, %s1718_s13  ;;  %v1890_v18 = vld [vmem:[%s1749_s12 + $0xd8] sm:$0xff]  ;;  %v1893_v19 = vld [vmem:[%s1749_s12 + $0xd0] sm:$0xff] }
  0x19   : > { %167 = vrot.lane.b32.xlu1 %v1772_v4, %s1718_s13 }
  0x1a   : > { %165 = vrot.lane.b32.xlu0 %v1775_v5, %s1718_s13 }
  0x1d   : > { %171 = vrot.lane.b32.xlu1 %v1782_v6, %s1718_s13 }
  0x1e   : > { %169 = vrot.lane.b32.xlu0 %v1785_v7, %s1718_s13 }
  0x21   : > { %191 = vrot.lane.b32.xlu1 %v1765_v3, %s1719_s14 }
  0x22   : > { %189 = vrot.lane.b32.xlu0 %v1755_v1, %s1719_s14 }
  0x25   : > { %195 = vrot.lane.b32.xlu1 %v1762_v2, %s1719_s14 }
  0x26   : > { %193 = vrot.lane.b32.xlu0 %v1752_v0, %s1719_s14 }
  0x29   : > { %199 = vrot.lane.b32.xlu1 %v1772_v4, %s1719_s14 }
  0x2a   : > { %197 = vrot.lane.b32.xlu0 %v1775_v5, %s1719_s14 }
  0x2d   : > { %203 = vrot.lane.b32.xlu1 %v1782_v6, %s1719_s14 }
  0x2e   : > { %201 = vrot.lane.b32.xlu0 %v1785_v7, %s1719_s14 }
  0x31   : > { %231 = vrot.lane.b32.xlu1 %v1765_v3, %s1720_s15 }
  0x32   : > { %229 = vrot.lane.b32.xlu0 %v1755_v1, %s1720_s15 }
  0x35   : > { %235 = vrot.lane.b32.xlu1 %v1762_v2, %s1720_s15 }
  0x36   : > { %233 = vrot.lane.b32.xlu0 %v1752_v0, %s1720_s15 }
  0x39   : > { %239 = vrot.lane.b32.xlu1 %v1772_v4, %s1720_s15 }
  0x3a   : > { %237 = vrot.lane.b32.xlu0 %v1775_v5, %s1720_s15 }
  0x3d   : > { %243 = vrot.lane.b32.xlu1 %v1782_v6, %s1720_s15 }
  0x3e   : > { %241 = vrot.lane.b32.xlu0 %v1785_v7, %s1720_s15 }
  0x41   : > { %338 = vrot.lane.b32.xlu1 %v1824_v8, %s1718_s13 }
  0x42   : > { %336 = vrot.lane.b32.xlu0 %v1827_v9, %s1718_s13 }
  0x45   : > { %355 = vrot.lane.b32.xlu1 %v1824_v8, %s1719_s14 }
  0x46   : > { %353 = vrot.lane.b32.xlu0 %v1827_v9, %s1719_s14 }
  0x49   : > { %400 = vrot.lane.b32.xlu1 %v1824_v8, %s1721_s16 }
  0x4a   : > { %398 = vrot.lane.b32.xlu0 %v1827_v9, %s1721_s16 }
  0x4d   : > { %433 = vrot.lane.b32.xlu1 %v1842_v10, %s1718_s13 }
  0x4e   : > { %431 = vrot.lane.b32.xlu0 %v1845_v11, %s1718_s13 }
  0x51   : > { %449 = vrot.lane.b32.xlu1 %v1842_v10, %s1719_s14 }
  0x52   : > { %447 = vrot.lane.b32.xlu0 %v1845_v11, %s1719_s14 }
  0x55   : > { %493 = vrot.lane.b32.xlu1 %v1842_v10, %s1721_s16 }
  0x56   : > { %491 = vrot.lane.b32.xlu0 %v1845_v11, %s1721_s16 }
  0x59   : > { %537 = vrot.lane.b32.xlu1 %v1860_v12, %s1718_s13 }
  0x5a   : > { %535 = vrot.lane.b32.xlu0 %v1863_v13, %s1718_s13 }
  0x5d   : > { %541 = vrot.lane.b32.xlu1 %v1870_v14, %s1718_s13 }
  0x5e   : > { %539 = vrot.lane.b32.xlu0 %v1873_v15, %s1718_s13 }
  0x61   : > { %545 = vrot.lane.b32.xlu1 %v1880_v16, %s1718_s13 }
  0x62   : > { %543 = vrot.lane.b32.xlu0 %v1883_v17, %s1718_s13 }
  0x65   : > { %549 = vrot.lane.b32.xlu1 %v1890_v18, %s1718_s13 }
  0x66   : > { %547 = vrot.lane.b32.xlu0 %v1893_v19, %s1718_s13 }
  0x69   : > { %569 = vrot.lane.b32.xlu1 %v1860_v12, %s1719_s14 }
  0x6a   : > { %567 = vrot.lane.b32.xlu0 %v1863_v13, %s1719_s14 }
  0x6d   : > { %573 = vrot.lane.b32.xlu1 %v1870_v14, %s1719_s14 }
  0x6e   : > { %571 = vrot.lane.b32.xlu0 %v1873_v15, %s1719_s14 }
  0x71   : > { %577 = vrot.lane.b32.xlu1 %v1880_v16, %s1719_s14 }
  0x72   : > { %575 = vrot.lane.b32.xlu0 %v1883_v17, %s1719_s14 }
  0x75   : > { %581 = vrot.lane.b32.xlu1 %v1890_v18, %s1719_s14 }
  0x76   : > { %579 = vrot.lane.b32.xlu0 %v1893_v19, %s1719_s14 }
  0x79   : > { %609 = vrot.lane.b32.xlu1 %v1860_v12, %s1720_s15 }
  0x7a   : > { %607 = vrot.lane.b32.xlu0 %v1863_v13, %s1720_s15 }
  0x83   : > { %v162_v20 = vpop.permute.xlu1 %161 }
  0x84   : > { %v158_v21 = vpop.permute.xlu0 %157  ;;  %v183_v34 = vadd.f32 %v162_v20, %v1752_v0 }
  0x85   : > { %v181_v28 = vadd.f32 %v158_v21, %v1755_v1 }
  0x87   : > { %v164_v22 = vpop.permute.xlu1 %163 }
  0x88   : > { %v160_v23 = vpop.permute.xlu0 %159  ;;  %v184_v35 = vadd.f32 %v164_v22, %v1762_v2 }
  0x89   : > { %v182_v29 = vadd.f32 %v160_v23, %v1765_v3 }
  0x8b   : > { %v168_v24 = vpop.permute.xlu1 %167 }
  0x8c   : > { %v166_v25 = vpop.permute.xlu0 %165  ;;  %v186_v42 = vadd.f32 %v168_v24, %v1772_v4  ;;  %v1723_v4 = vmov 0.0  }
  0x8d   : > { %v185_v43 = vadd.f32 %v166_v25, %v1775_v5  ;;  %419 = vst.msk [vmem:[%s1979_s21] sm:$0x1] %vm418_vm0, %v1723_v4  ;;  %787 = vst.msk [vmem:[%s1979_s21 + $0x12] sm:$0x1] %vm418_vm0, %v1723_v4 }
  0x8e   : > { %1155 = vst.msk [vmem:[%s1979_s21 + $0x24] sm:$0x1] %vm418_vm0, %v1723_v4  ;;  %1523 = vst.msk [vmem:[%s1979_s21 + $0x36] sm:$0x1] %vm418_vm0, %v1723_v4 }
  0x8f   : > { %v172_v26 = vpop.permute.xlu1 %171  ;;  %420 = vst.msk [vmem:[%s1979_s21 + $0x48] sm:$0x1] %vm418_vm0, %v1723_v4  ;;  %788 = vst.msk [vmem:[%s1979_s21 + $0x5a] sm:$0x1] %vm418_vm0, %v1723_v4 }
  0x90   : > { %v170_v27 = vpop.permute.xlu0 %169  ;;  %v188_v50 = vadd.f32 %v172_v26, %v1782_v6  ;;  %1156 = vst.msk [vmem:[%s1979_s21 + $0x6c] sm:$0x1] %vm418_vm0, %v1723_v4  ;;  %1524 = vst.msk [vmem:[%s1979_s21 + $0x7e] sm:$0x1] %vm418_vm0, %v1723_v4 }
  0x91   : > { %v187_v51 = vadd.f32 %v170_v27, %v1785_v7  ;;  %517 = vst.msk [vmem:[%s1979_s21 + $0xa1] sm:$0x1] %vm418_vm0, %v1723_v4  ;;  %518 = vst.msk [vmem:[%s1979_s21 + $0xe9] sm:$0x1] %vm418_vm0, %v1723_v4 }
  0x92   : > { %885 = vst.msk [vmem:[%s1979_s21 + $0xb3] sm:$0x1] %vm418_vm0, %v1723_v4  ;;  %886 = vst.msk [vmem:[%s1979_s21 + $0xfb] sm:$0x1] %vm418_vm0, %v1723_v4 }
  0x93   : > { %v192_v30 = vpop.permute.xlu1 %191  ;;  %1253 = vst.msk [vmem:[%s1979_s21 + $0xc5] sm:$0x1] %vm418_vm0, %v1723_v4  ;;  %1254 = vst.msk [vmem:[%s1979_s21 + $0x10d] sm:$0x1] %vm418_vm0, %v1723_v4 }
  0x94   : > { %v190_v31 = vpop.permute.xlu0 %189  ;;  %v214_v32 = vadd.f32 %v192_v30, %v182_v29  ;;  %1621 = vst.msk [vmem:[%s1979_s21 + $0xd7] sm:$0x1] %vm418_vm0, %v1723_v4  ;;  %1622 = vst.msk [vmem:[%s1979_s21 + $0x11f] sm:$0x1] %vm418_vm0, %v1723_v4 }
  0x95   : > { %v213_v33 = vadd.f32 %v190_v31, %v181_v28 }
  0x96   : > { %v1923_v36 = vmul.f32 0.33333334, %v214_v32 }
  0x97   : > { %v1925_v37 = vmul.f32 0.33333334, %v213_v33  ;;  %v196_v38 = vpop.permute.xlu1 %195 }
  0x98   : > { %v194_v39 = vpop.permute.xlu0 %193  ;;  %v216_v40 = vadd.f32 %v196_v38, %v184_v35  ;;  %263 = vrot.lane.b32.xlu1 %v1923_v36, %s1722_s17 }
  0x99   : > { %v215_v41 = vadd.f32 %v194_v39, %v183_v34  ;;  %261 = vrot.lane.b32.xlu0 %v1925_v37, %s1722_s17 }
  0x9a   : > { %v1933_v44 = vmul.f32 0.33333334, %v216_v40 }
  0x9b   : > { %v1935_v45 = vmul.f32 0.33333334, %v215_v41  ;;  %v200_v46 = vpop.permute.xlu1 %199 }
  0x9c   : > { %v198_v47 = vpop.permute.xlu0 %197  ;;  %v218_v48 = vadd.f32 %v200_v46, %v186_v42  ;;  %267 = vrot.lane.b32.xlu1 %v1933_v44, %s1722_s17 }
  0x9d   : > { %v217_v49 = vadd.f32 %v198_v47, %v185_v43  ;;  %265 = vrot.lane.b32.xlu0 %v1935_v45, %s1722_s17 }
  0x9e   : > { %v1943_v52 = vmul.f32 0.33333334, %v218_v48 }
  0x9f   : > { %v1945_v53 = vmul.f32 0.33333334, %v217_v49  ;;  %v204_v54 = vpop.permute.xlu1 %203 }
  0xa0   : > { %v202_v55 = vpop.permute.xlu0 %201  ;;  %v220_v56 = vadd.f32 %v204_v54, %v188_v50  ;;  %271 = vrot.lane.b32.xlu1 %v1943_v52, %s1722_s17 }
  0xa1   : > { %v219_v57 = vadd.f32 %v202_v55, %v187_v51  ;;  %269 = vrot.lane.b32.xlu0 %v1945_v53, %s1722_s17 }
  0xa2   : > { %v1951_v58 = vmul.f32 0.33333334, %v220_v56 }
  0xa3   : > { %v1953_v59 = vmul.f32 0.33333334, %v219_v57  ;;  %v1955_v60 = vpop.permute.xlu1 %231 }
  0xa4   : > { %v1957_v61 = vpop.permute.xlu0 %229  ;;  %275 = vrot.lane.b32.xlu1 %v1951_v58, %s1722_s17 }
  0xa5   : > { %273 = vrot.lane.b32.xlu0 %v1953_v59, %s1722_s17 }
  0xa7   : > { %v1963_v62 = vpop.permute.xlu1 %235 }
  0xa8   : > { %v1965_v63 = vpop.permute.xlu0 %233 }
  0xab   : > { %v1967_v0 = vpop.permute.xlu1 %239 }
  0xac   : > { %v1969_v1 = vpop.permute.xlu0 %237 }
  0xaf   : > { %v1972_v2 = vpop.permute.xlu1 %243 }
  0xb0   : > { %v1974_v3 = vpop.permute.xlu0 %241 }
  0xb3   : > { %v339_v5 = vpop.permute.xlu1 %338 }
  0xb4   : > { %v337_v6 = vpop.permute.xlu0 %336  ;;  %v348_v7 = vsel %vm344_vm1, %v339_v5, 0.0 }
  0xb5   : > { %v347_v20 = vsel %vm344_vm1, %v337_v6, 0.0  ;;  %v369_v21 = vadd.f32 %v348_v7, %v1824_v8 }
  0xb6   : > { %v368_v22 = vadd.f32 %v347_v20, %v1827_v9 }
  0xb7   : > { %v356_v23 = vpop.permute.xlu1 %355 }
  0xb8   : > { %v354_v24 = vpop.permute.xlu0 %353  ;;  %v365_v25 = vsel %vm361_vm2, %v356_v23, 0.0 }
  0xb9   : > { %v364_v26 = vsel %vm361_vm2, %v354_v24, 0.0  ;;  %v373_v27 = vadd.f32 %v369_v21, %v365_v25 }
  0xba   : > { %v372_v28 = vadd.f32 %v368_v22, %v364_v26 }
  0xbb   : > { %v377_v29 = vmul.f32 0.33333334, %v373_v27  ;;  %v2011_v31 = vpop.permute.xlu1 %400 }
  0xbc   : > { %v376_v30 = vmul.f32 0.33333334, %v372_v28  ;;  %v2013_v32 = vpop.permute.xlu0 %398 }
  0xbd   : > { %388 = vrot.lane.b32.xlu1 %v377_v29, %s1720_s15 }
  0xbe   : > { %386 = vrot.lane.b32.xlu0 %v376_v30, %s1720_s15 }
  0xbf   : > { %v434_v33 = vpop.permute.xlu1 %433 }
  0xc0   : > { %v432_v34 = vpop.permute.xlu0 %431  ;;  %v444_v35 = vsel %vm344_vm1, %v434_v33, 0.0 }
  0xc1   : > { %v443_v38 = vsel %vm344_vm1, %v432_v34, 0.0  ;;  %v464_v39 = vadd.f32 %v444_v35, %v1842_v10 }
  0xc2   : > { %v463_v40 = vadd.f32 %v443_v38, %v1845_v11 }
  0xc3   : > { %v450_v41 = vpop.permute.xlu1 %449 }
  0xc4   : > { %v448_v42 = vpop.permute.xlu0 %447  ;;  %v460_v43 = vsel %vm361_vm2, %v450_v41, 0.0 }
  0xc5   : > { %v459_v46 = vsel %vm361_vm2, %v448_v42, 0.0  ;;  %v468_v47 = vadd.f32 %v464_v39, %v460_v43 }
  0xc6   : > { %v467_v48 = vadd.f32 %v463_v40, %v459_v46 }
  0xc7   : > { %v472_v49 = vmul.f32 0.33333334, %v468_v47  ;;  %v2023_v51 = vpop.permute.xlu1 %493 }
  0xc8   : > { %v471_v50 = vmul.f32 0.33333334, %v467_v48  ;;  %v2025_v54 = vpop.permute.xlu0 %491 }
  0xc9   : > { %481 = vrot.lane.b32.xlu1 %v472_v49, %s1720_s15 }
  0xca   : > { %479 = vrot.lane.b32.xlu0 %v471_v50, %s1720_s15 }
  0xcb   : > { %v538_v55 = vpop.permute.xlu1 %537 }
  0xcc   : > { %v536_v56 = vpop.permute.xlu0 %535  ;;  %v560_v22 = vadd.f32 %v538_v55, %v1860_v12 }
  0xcd   : > { %613 = vrot.lane.b32.xlu1 %v1870_v14, %s1720_s15  ;;  %v559_v23 = vadd.f32 %v536_v56, %v1863_v13 }
  0xce   : > { %611 = vrot.lane.b32.xlu0 %v1873_v15, %s1720_s15 }
  0xcf   : > { %v542_v57 = vpop.permute.xlu1 %541 }
  0xd0   : > { %v540_v5 = vpop.permute.xlu0 %539  ;;  %v562_v28 = vadd.f32 %v542_v57, %v1870_v14 }
  0xd1   : > { %617 = vrot.lane.b32.xlu1 %v1880_v16, %s1720_s15  ;;  %v561_v29 = vadd.f32 %v540_v5, %v1873_v15  ;;  %v125_v5 = vlaneseq }
  0xd2   : > { %615 = vrot.lane.b32.xlu0 %v1883_v17, %s1720_s15 }
  0xd3   : > { %v546_v6 = vpop.permute.xlu1 %545 }
  0xd4   : > { %v544_v7 = vpop.permute.xlu0 %543  ;;  %v564_v12 = vadd.f32 %v546_v6, %v1880_v16  ;;  %v126_v6 = vand.u32 127, %v125_v5 }
  0xd5   : > { %621 = vrot.lane.b32.xlu1 %v1890_v18, %s1720_s15  ;;  %v563_v13 = vadd.f32 %v544_v7, %v1883_v17 }
  0xd6   : > { %619 = vrot.lane.b32.xlu0 %v1893_v19, %s1720_s15  ;;  %vm127_vm3 = vcmp.lt.s32.totalorder %v126_v6, 1  ;;  %vm130_vm9 = vcmp.ge.s32.totalorder %v126_v6, 17 }
  0xd7   : > { %v550_v20 = vpop.permute.xlu1 %549  ;;  %vm2099_vm7 = vmxor %vm127_vm3, %vm1724_vm6 }
  0xd8   : > { %v548_v21 = vpop.permute.xlu0 %547  ;;  %v566_v16 = vadd.f32 %v550_v20, %v1890_v18  ;;  %v2082_v18 = vld [vmem:[%s1749_s12 + $0xd0] sm:$0x1]  ;;  %vm2119_vm10 = vmxor %vm130_vm9, %vm1724_vm6 }
  0xd9   : > { %v565_v17 = vadd.f32 %v548_v21, %v1893_v19  ;;  %v2085_v19 = vld [vmem:[%s1749_s12 + $0x90] sm:$0x1] }
  0xdb   : > { %v570_v24 = vpop.permute.xlu1 %569 }
  0xdc   : > { %v568_v25 = vpop.permute.xlu0 %567  ;;  %v592_v26 = vadd.f32 %v570_v24, %v560_v22  ;;  %v287_v22 = vsel %vm285_vm4, %v1923_v36, %v1955_v60  ;;  %v289_v60 = vsel %vm285_vm4, %v1933_v44, %v1963_v62  ;;  %v291_v44 = vsel %vm285_vm4, %v1943_v52, %v1967_v0 }
  0xdd   : > { %v591_v27 = vadd.f32 %v568_v25, %v559_v23  ;;  %v286_v23 = vsel %vm285_vm4, %v1925_v37, %v1957_v61  ;;  %v288_v61 = vsel %vm285_vm4, %v1935_v45, %v1965_v63  ;;  %v290_v45 = vsel %vm285_vm4, %v1945_v53, %v1969_v1 }
  0xde   : > { %v2045_v30 = vmul.f32 0.33333334, %v592_v26  ;;  %v293_v52 = vsel %vm285_vm4, %v1951_v58, %v1972_v2  ;;  %v292_v53 = vsel %vm285_vm4, %v1953_v59, %v1974_v3 }
  0xdf   : > { %v2047_v33 = vmul.f32 0.33333334, %v591_v27  ;;  %v574_v34 = vpop.permute.xlu1 %573 }
  0xe0   : > { %v572_v35 = vpop.permute.xlu0 %571  ;;  %v594_v38 = vadd.f32 %v574_v34, %v562_v28  ;;  %641 = vrot.lane.b32.xlu1 %v2045_v30, %s1722_s17 }
  0xe1   : > { %v593_v39 = vadd.f32 %v572_v35, %v561_v29  ;;  %639 = vrot.lane.b32.xlu0 %v2047_v33, %s1722_s17 }
  0xe2   : > { %v2055_v14 = vmul.f32 0.33333334, %v594_v38 }
  0xe3   : > { %v2057_v15 = vmul.f32 0.33333334, %v593_v39  ;;  %v578_v40 = vpop.permute.xlu1 %577 }
  0xe4   : > { %v576_v41 = vpop.permute.xlu0 %575  ;;  %v596_v42 = vadd.f32 %v578_v40, %v564_v12  ;;  %645 = vrot.lane.b32.xlu1 %v2055_v14, %s1722_s17 }
  0xe5   : > { %v595_v43 = vadd.f32 %v576_v41, %v563_v13  ;;  %643 = vrot.lane.b32.xlu0 %v2057_v15, %s1722_s17 }
  0xe6   : > { %v2065_v46 = vmul.f32 0.33333334, %v596_v42 }
  0xe7   : > { %v2067_v47 = vmul.f32 0.33333334, %v595_v43  ;;  %v582_v48 = vpop.permute.xlu1 %581 }
  0xe8   : > { %v580_v49 = vpop.permute.xlu0 %579  ;;  %v598_v50 = vadd.f32 %v582_v48, %v566_v16  ;;  %649 = vrot.lane.b32.xlu1 %v2065_v46, %s1722_s17 }
  0xe9   : > { %v597_v55 = vadd.f32 %v580_v49, %v565_v17  ;;  %647 = vrot.lane.b32.xlu0 %v2067_v47, %s1722_s17 }
  0xea   : > { %v2073_v56 = vmul.f32 0.33333334, %v598_v50 }
  0xeb   : > { %v2075_v57 = vmul.f32 0.33333334, %v597_v55  ;;  %v2095_v7 = vpop.permute.xlu1 %609 }
  0xec   : > { %653 = vrot.lane.b32.xlu1 %v2073_v56, %s1722_s17  ;;  %v2097_v20 = vpop.permute.xlu0 %607 }
  0xed   : > { %651 = vrot.lane.b32.xlu0 %v2075_v57, %s1722_s17 }
  0xf0   : > { %709 = vrot.lane.b32.xlu1 %v2082_v18, %s1718_s13 }
  0xf1   : > { %707 = vrot.lane.b32.xlu0 %v2085_v19, %s1718_s13 }
  0xf4   : > { %725 = vrot.lane.b32.xlu1 %v2082_v18, %s1719_s14 }
  0xf5   : > { %723 = vrot.lane.b32.xlu0 %v2085_v19, %s1719_s14 }
 0x10a   : > { %v264_v24 = vpop.permute.xlu1 %263 }
 0x10b   : > { %v262_v25 = vpop.permute.xlu0 %261  ;;  %v296_v26 = vsel %vm294_vm5, %v287_v22, %v264_v24 }
 0x10c   : > { %v295_v27 = vsel %vm294_vm5, %v286_v23, %v262_v25  ;;  %v308_v28 = vsel %vm2099_vm7, %v296_v26, 0.0 }
 0x10d   : > { %v307_v36 = vsel %vm2099_vm7, %v295_v27, 0.0  ;;  %317 = vst.msk [vmem:[%s1979_s21 + $0x9] sm:$0xff] %vm315_vm8, %v308_v28  ;;  %v664_v27 = vsel %vm285_vm4, %v2045_v30, %v2095_v7  ;;  %v663_v28 = vsel %vm285_vm4, %v2047_v33, %v2097_v20 }
 0x10e   : > { %316 = vst.msk [vmem:[%s1979_s21 + $0x1] sm:$0xff] %vm315_vm8, %v307_v36  ;;  %v268_v29 = vpop.permute.xlu1 %267 }
 0x10f   : > { %v266_v34 = vpop.permute.xlu0 %265  ;;  %v298_v35 = vsel %vm294_vm5, %v289_v60, %v268_v29 }
 0x110   : > { %v297_v38 = vsel %vm294_vm5, %v288_v61, %v266_v34  ;;  %v310_v39 = vsel %vm2119_vm10, %v298_v35, 0.0 }
 0x111   : > { %v309_v12 = vsel %vm2119_vm10, %v297_v38, 0.0  ;;  %319 = vst.msk [vmem:[%s1979_s21 + $0x51] sm:$0xff] %vm315_vm8, %v310_v39 }
 0x112   : > { %318 = vst.msk [vmem:[%s1979_s21 + $0x49] sm:$0xff] %vm315_vm8, %v309_v12  ;;  %v272_v62 = vpop.permute.xlu1 %271 }
 0x113   : > { %v270_v63 = vpop.permute.xlu0 %269  ;;  %v300_v13 = vsel %vm294_vm5, %v291_v44, %v272_v62 }
 0x114   : > { %v299_v40 = vsel %vm294_vm5, %v290_v45, %v270_v63  ;;  %v312_v41 = vsel %vm2099_vm7, %v300_v13, 0.0 }
 0x115   : > { %v311_v42 = vsel %vm2099_vm7, %v299_v40, 0.0  ;;  %321 = vst.msk [vmem:[%s1979_s21 + $0x99] sm:$0xff] %vm315_vm8, %v312_v41 }
 0x116   : > { %320 = vst.msk [vmem:[%s1979_s21 + $0x91] sm:$0xff] %vm315_vm8, %v311_v42  ;;  %v276_v0 = vpop.permute.xlu1 %275 }
 0x117   : > { %v274_v1 = vpop.permute.xlu0 %273  ;;  %v302_v43 = vsel %vm294_vm5, %v293_v52, %v276_v0 }
 0x118   : > { %v301_v16 = vsel %vm294_vm5, %v292_v53, %v274_v1  ;;  %v314_v17 = vsel %vm2119_vm10, %v302_v43, 0.0 }
 0x119   : > { %v313_v48 = vsel %vm2119_vm10, %v301_v16, 0.0  ;;  %323 = vst.msk [vmem:[%s1979_s21 + $0xe1] sm:$0xff] %vm315_vm8, %v314_v17 }
 0x11a   : > { %322 = vst.msk [vmem:[%s1979_s21 + $0xd9] sm:$0xff] %vm315_vm8, %v313_v48 }
 0x12f   : > { %v389_v58 = vpop.permute.xlu1 %388 }
 0x130   : > { %v387_v59 = vpop.permute.xlu0 %386  ;;  %v409_v2 = vsel %vm285_vm4, %v1824_v8, %v389_v58 }
 0x131   : > { %v408_v3 = vsel %vm285_vm4, %v1827_v9, %v387_v59  ;;  %v413_v49 = vsel %vm294_vm5, %v409_v2, %v2011_v31 }
 0x132   : > { %v412_v50 = vsel %vm294_vm5, %v408_v3, %v2013_v32  ;;  %v417_v55 = vsel %vm2119_vm10, %v413_v49, 0.0 }
 0x133   : > { %v416_v5 = vsel %vm2099_vm7, %v412_v50, 0.0  ;;  %422 = vst.msk [vmem:[%s1979_s21 + $0xd8] sm:$0x1] %vm418_vm0, %v417_v55 }
 0x134   : > { %421 = vst.msk [vmem:[%s1979_s21 + $0x90] sm:$0x1] %vm418_vm0, %v416_v5 }
 0x13b   : > { %v482_v8 = vpop.permute.xlu1 %481 }
 0x13c   : > { %v480_v9 = vpop.permute.xlu0 %479  ;;  %v504_v31 = vsel %vm285_vm4, %v1842_v10, %v482_v8 }
 0x13d   : > { %v503_v6 = vsel %vm285_vm4, %v1845_v11, %v480_v9  ;;  %v508_v32 = vsel %vm294_vm5, %v504_v31, %v2023_v51  ;;  %v2280_v9 = vld [vmem:[%s1749_s12 + $0x5f] sm:$0x1] }
 0x13e   : > { %v507_v22 = vsel %vm294_vm5, %v503_v6, %v2025_v54  ;;  %v512_v23 = vsel %vm2119_vm10, %v508_v32, 0.0  ;;  %v2283_v31 = vld [vmem:[%s1749_s12 + $0x1f] sm:$0x1] }
 0x13f   : > { %v511_v24 = vsel %vm2099_vm7, %v507_v22, 0.0  ;;  %516 = vst.msk [vmem:[%s1979_s21 + $0x59] sm:$0x1] %vm418_vm0, %v512_v23  ;;  %v614_v10 = vpop.permute.xlu1 %613 }
 0x140   : > { %515 = vst.msk [vmem:[%s1979_s21 + $0x11] sm:$0x1] %vm418_vm0, %v511_v24  ;;  %v612_v11 = vpop.permute.xlu0 %611  ;;  %v666_v30 = vsel %vm285_vm4, %v2055_v14, %v614_v10 }
 0x141   : > { %v665_v33 = vsel %vm285_vm4, %v2057_v15, %v612_v11 }
 0x143   : > { %v618_v51 = vpop.permute.xlu1 %617 }
 0x144   : > { %v616_v54 = vpop.permute.xlu0 %615  ;;  %v668_v14 = vsel %vm285_vm4, %v2065_v46, %v618_v51 }
 0x145   : > { %v667_v15 = vsel %vm285_vm4, %v2067_v47, %v616_v54 }
 0x147   : > { %v622_v25 = vpop.permute.xlu1 %621 }
 0x148   : > { %v620_v26 = vpop.permute.xlu0 %619  ;;  %v670_v46 = vsel %vm285_vm4, %v2073_v56, %v622_v25 }
 0x149   : > { %v669_v47 = vsel %vm285_vm4, %v2075_v57, %v620_v26 }
 0x152   : > { %v642_v36 = vpop.permute.xlu1 %641 }
 0x153   : > { %v640_v60 = vpop.permute.xlu0 %639  ;;  %v672_v61 = vsel %vm294_vm5, %v664_v27, %v642_v36 }
 0x154   : > { %v671_v29 = vsel %vm294_vm5, %v663_v28, %v640_v60  ;;  %v680_v34 = vsel %vm2099_vm7, %v672_v61, 0.0 }
 0x155   : > { %v679_v35 = vsel %vm2099_vm7, %v671_v29, 0.0  ;;  %688 = vst.msk [vmem:[%s1979_s21 + $0x1b] sm:$0xff] %vm315_vm8, %v680_v34 }
 0x156   : > { %687 = vst.msk [vmem:[%s1979_s21 + $0x13] sm:$0xff] %vm315_vm8, %v679_v35  ;;  %v646_v7 = vpop.permute.xlu1 %645 }
 0x157   : > { %v644_v20 = vpop.permute.xlu0 %643  ;;  %v674_v38 = vsel %vm294_vm5, %v666_v30, %v646_v7 }
 0x158   : > { %v673_v39 = vsel %vm294_vm5, %v665_v33, %v644_v20  ;;  %v682_v12 = vsel %vm2119_vm10, %v674_v38, 0.0  ;;  %v888_v20 = vld [vmem:[%s1749_s12 + $0x28] sm:$0xff]  ;;  %v887_v38 = vld [vmem:[%s1749_s12 + $0x20] sm:$0xff] }
 0x159   : > { %v681_v44 = vsel %vm2119_vm10, %v673_v39, 0.0  ;;  %690 = vst.msk [vmem:[%s1979_s21 + $0x63] sm:$0xff] %vm315_vm8, %v682_v12  ;;  %v890_v39 = vld [vmem:[%s1749_s12 + $0x68] sm:$0xff]  ;;  %v889_v12 = vld [vmem:[%s1749_s12 + $0x60] sm:$0xff] }
 0x15a   : > { %689 = vst.msk [vmem:[%s1979_s21 + $0x5b] sm:$0xff] %vm315_vm8, %v681_v44  ;;  %v650_v45 = vpop.permute.xlu1 %649  ;;  %v892_v44 = vld [vmem:[%s1749_s12 + $0xa8] sm:$0xff] }
 0x15b   : > { %v648_v62 = vpop.permute.xlu0 %647  ;;  %v676_v63 = vsel %vm294_vm5, %v668_v14, %v650_v45  ;;  %v891_v14 = vld [vmem:[%s1749_s12 + $0xa0] sm:$0xff] }
 0x15c   : > { %v675_v13 = vsel %vm294_vm5, %v667_v15, %v648_v62  ;;  %v684_v40 = vsel %vm2099_vm7, %v676_v63, 0.0  ;;  %v2332_v15 = vld [vmem:[%s1749_s12 + $0xe8] sm:$0xff]  ;;  %v2335_v45 = vld [vmem:[%s1749_s12 + $0xe0] sm:$0xff] }
 0x15d   : > { %v683_v41 = vsel %vm2099_vm7, %v675_v13, 0.0  ;;  %692 = vst.msk [vmem:[%s1979_s21 + $0xab] sm:$0xff] %vm315_vm8, %v684_v40 }
 0x15e   : > { %691 = vst.msk [vmem:[%s1979_s21 + $0xa3] sm:$0xff] %vm315_vm8, %v683_v41  ;;  %v654_v42 = vpop.permute.xlu1 %653 }
 0x15f   : > { %v652_v52 = vpop.permute.xlu0 %651  ;;  %v678_v53 = vsel %vm294_vm5, %v670_v46, %v654_v42 }
 0x160   : > { %v677_v0 = vsel %vm294_vm5, %v669_v47, %v652_v52  ;;  %v686_v1 = vsel %vm2119_vm10, %v678_v53, 0.0 }
 0x161   : > { %v685_v43 = vsel %vm2119_vm10, %v677_v0, 0.0  ;;  %694 = vst.msk [vmem:[%s1979_s21 + $0xf3] sm:$0xff] %vm315_vm8, %v686_v1 }
 0x162   : > { %693 = vst.msk [vmem:[%s1979_s21 + $0xeb] sm:$0xff] %vm315_vm8, %v685_v43  ;;  %v710_v56 = vpop.permute.xlu1 %709 }
 0x163   : > { %v708_v16 = vpop.permute.xlu0 %707  ;;  %v718_v57 = vsel %vm344_vm1, %v710_v56, 0.0 }
 0x164   : > { %v717_v17 = vsel %vm344_vm1, %v708_v16, 0.0  ;;  %v738_v48 = vadd.f32 %v718_v57, %v2082_v18 }
 0x165   : > { %v737_v58 = vadd.f32 %v717_v17, %v2085_v19 }
 0x166   : > { %v726_v59 = vpop.permute.xlu1 %725 }
 0x167   : > { %v724_v2 = vpop.permute.xlu0 %723  ;;  %v734_v3 = vsel %vm361_vm2, %v726_v59, 0.0 }
 0x168   : > { %v733_v49 = vsel %vm361_vm2, %v724_v2, 0.0  ;;  %v742_v50 = vadd.f32 %v738_v48, %v734_v3 }
 0x169   : > { %v741_v55 = vadd.f32 %v737_v58, %v733_v49 }
 0x16a   : > { %v746_v5 = vmul.f32 0.33333334, %v742_v50 }
 0x16b   : > { %v745_v8 = vmul.f32 0.33333334, %v741_v55 }
 0x16c   : > { %757 = vrot.lane.b32.xlu1 %v746_v5, %s1720_s15 }
 0x16d   : > { %755 = vrot.lane.b32.xlu0 %v745_v8, %s1720_s15 }
 0x170   : > { %769 = vrot.lane.b32.xlu1 %v2082_v18, %s1721_s16 }
 0x171   : > { %767 = vrot.lane.b32.xlu0 %v2085_v19, %s1721_s16 }
 0x174   : > { %801 = vrot.lane.b32.xlu1 %v2280_v9, %s1718_s13 }
 0x175   : > { %799 = vrot.lane.b32.xlu0 %v2283_v31, %s1718_s13 }
 0x178   : > { %817 = vrot.lane.b32.xlu1 %v2280_v9, %s1719_s14 }
 0x179   : > { %815 = vrot.lane.b32.xlu0 %v2283_v31, %s1719_s14 }
 0x1de   : > { %v758_v6 = vpop.permute.xlu1 %757 }
 0x1df   : > { %v756_v32 = vpop.permute.xlu0 %755  ;;  %v778_v22 = vsel %vm285_vm4, %v2082_v18, %v758_v6 }
 0x1e0   : > { %v777_v23 = vsel %vm285_vm4, %v2085_v19, %v756_v32 }
 0x1e2   : > { %v770_v24 = vpop.permute.xlu1 %769 }
 0x1e3   : > { %v768_v10 = vpop.permute.xlu0 %767  ;;  %v782_v11 = vsel %vm294_vm5, %v778_v22, %v770_v24 }
 0x1e4   : > { %v781_v51 = vsel %vm294_vm5, %v777_v23, %v768_v10  ;;  %v786_v54 = vsel %vm2119_vm10, %v782_v11, 0.0 }
 0x1e5   : > { %v785_v25 = vsel %vm2099_vm7, %v781_v51, 0.0  ;;  %790 = vst.msk [vmem:[%s1979_s21 + $0xea] sm:$0x1] %vm418_vm0, %v786_v54 }
 0x1e6   : > { %789 = vst.msk [vmem:[%s1979_s21 + $0xa2] sm:$0x1] %vm418_vm0, %v785_v25  ;;  %v802_v18 = vpop.permute.xlu1 %801 }
 0x1e7   : > { %v800_v26 = vpop.permute.xlu0 %799  ;;  %v812_v19 = vsel %vm344_vm1, %v802_v18, 0.0 }
 0x1e8   : > { %v811_v27 = vsel %vm344_vm1, %v800_v26, 0.0  ;;  %v832_v28 = vadd.f32 %v812_v19, %v2280_v9 }
 0x1e9   : > { %v831_v36 = vadd.f32 %v811_v27, %v2283_v31 }
 0x1ea   : > { %v818_v60 = vpop.permute.xlu1 %817 }
 0x1eb   : > { %v816_v61 = vpop.permute.xlu0 %815  ;;  %v828_v29 = vsel %vm361_vm2, %v818_v60, 0.0 }
 0x1ec   : > { %v827_v34 = vsel %vm361_vm2, %v816_v61, 0.0  ;;  %v836_v35 = vadd.f32 %v832_v28, %v828_v29 }
 0x1ed   : > { %v835_v30 = vadd.f32 %v831_v36, %v827_v34 }
 0x1ee   : > { %v840_v33 = vmul.f32 0.33333334, %v836_v35 }
 0x1ef   : > { %v839_v7 = vmul.f32 0.33333334, %v835_v30  ;;  %v2416_v30 = vld [vmem:[%s1749_s12 + $0x3f] sm:$0x1] }
 0x1f0   : > { %849 = vrot.lane.b32.xlu1 %v840_v33, %s1720_s15  ;;  %v2419_v33 = vld [vmem:[%s1749_s12 + $0x2f] sm:$0x1] }
 0x1f1   : > { %847 = vrot.lane.b32.xlu0 %v839_v7, %s1720_s15  ;;  %v2426_v7 = vld [vmem:[%s1749_s12 + $0x7f] sm:$0x1] }
 0x1f4   : > { %861 = vrot.lane.b32.xlu1 %v2280_v9, %s1721_s16 }
 0x1f5   : > { %859 = vrot.lane.b32.xlu0 %v2283_v31, %s1721_s16 }
 0x1f8   : > { %905 = vrot.lane.b32.xlu1 %v888_v20, %s1718_s13 }
 0x1f9   : > { %903 = vrot.lane.b32.xlu0 %v887_v38, %s1718_s13 }
 0x1fc   : > { %909 = vrot.lane.b32.xlu1 %v890_v39, %s1718_s13 }
 0x1fd   : > { %907 = vrot.lane.b32.xlu0 %v889_v12, %s1718_s13 }
 0x200   : > { %913 = vrot.lane.b32.xlu1 %v892_v44, %s1718_s13 }
 0x201   : > { %911 = vrot.lane.b32.xlu0 %v891_v14, %s1718_s13 }
 0x204   : > { %917 = vrot.lane.b32.xlu1 %v2332_v15, %s1718_s13 }
 0x205   : > { %915 = vrot.lane.b32.xlu0 %v2335_v45, %s1718_s13 }
 0x208   : > { %937 = vrot.lane.b32.xlu1 %v888_v20, %s1719_s14 }
 0x209   : > { %935 = vrot.lane.b32.xlu0 %v887_v38, %s1719_s14 }
 0x20c   : > { %941 = vrot.lane.b32.xlu1 %v890_v39, %s1719_s14 }
 0x20d   : > { %939 = vrot.lane.b32.xlu0 %v889_v12, %s1719_s14 }
 0x210   : > { %945 = vrot.lane.b32.xlu1 %v892_v44, %s1719_s14 }
 0x211   : > { %943 = vrot.lane.b32.xlu0 %v891_v14, %s1719_s14 }
 0x214   : > { %949 = vrot.lane.b32.xlu1 %v2332_v15, %s1719_s14 }
 0x215   : > { %947 = vrot.lane.b32.xlu0 %v2335_v45, %s1719_s14 }
 0x218   : > { %977 = vrot.lane.b32.xlu1 %v888_v20, %s1720_s15 }
 0x219   : > { %975 = vrot.lane.b32.xlu0 %v887_v38, %s1720_s15 }
 0x21c   : > { %981 = vrot.lane.b32.xlu1 %v890_v39, %s1720_s15 }
 0x21d   : > { %979 = vrot.lane.b32.xlu0 %v889_v12, %s1720_s15 }
 0x220   : > { %985 = vrot.lane.b32.xlu1 %v892_v44, %s1720_s15 }
 0x221   : > { %983 = vrot.lane.b32.xlu0 %v891_v14, %s1720_s15 }
 0x224   : > { %989 = vrot.lane.b32.xlu1 %v2332_v15, %s1720_s15 }
 0x225   : > { %987 = vrot.lane.b32.xlu0 %v2335_v45, %s1720_s15 }
 0x262   : > { %v850_v62 = vpop.permute.xlu1 %849 }
 0x263   : > { %v848_v63 = vpop.permute.xlu0 %847  ;;  %v872_v13 = vsel %vm285_vm4, %v2280_v9, %v850_v62  ;;  %v2477_v62 = vld [vmem:[%s1749_s12 + $0xf0] sm:$0x1] }
 0x264   : > { %v871_v40 = vsel %vm285_vm4, %v2283_v31, %v848_v63  ;;  %v2484_v63 = vld [vmem:[%s1749_s12 + $0xb0] sm:$0xff] }
 0x266   : > { %v862_v41 = vpop.permute.xlu1 %861 }
 0x267   : > { %v860_v46 = vpop.permute.xlu0 %859  ;;  %v876_v47 = vsel %vm294_vm5, %v872_v13, %v862_v41  ;;  %v2491_v13 = vld [vmem:[%s1749_s12 + $0xb8] sm:$0xff] }
 0x268   : > { %v875_v42 = vsel %vm294_vm5, %v871_v40, %v860_v46  ;;  %v880_v52 = vsel %vm2119_vm10, %v876_v47, 0.0  ;;  %v2502_v40 = vld [vmem:[%s1749_s12 + $0xf0] sm:$0xff]  ;;  %v2509_v41 = vld [vmem:[%s1749_s12 + $0xf8] sm:$0xff] }
 0x269   : > { %v879_v53 = vsel %vm2099_vm7, %v875_v42, 0.0  ;;  %884 = vst.msk [vmem:[%s1979_s21 + $0x6b] sm:$0x1] %vm418_vm0, %v880_v52 }
 0x26a   : > { %883 = vst.msk [vmem:[%s1979_s21 + $0x23] sm:$0x1] %vm418_vm0, %v879_v53  ;;  %v906_v0 = vpop.permute.xlu1 %905 }
 0x26b   : > { %v904_v1 = vpop.permute.xlu0 %903  ;;  %v928_v58 = vadd.f32 %v906_v0, %v888_v20  ;;  %v2429_v20 = vld [vmem:[%s1749_s12 + $0x6f] sm:$0x1] }
 0x26c   : > { %v927_v59 = vadd.f32 %v904_v1, %v887_v38  ;;  %v2436_v38 = vld [vmem:[%s1749_s12 + $0xa0] sm:$0x1] }
 0x26e   : > { %v910_v43 = vpop.permute.xlu1 %909 }
 0x26f   : > { %v908_v56 = vpop.permute.xlu0 %907  ;;  %v930_v55 = vadd.f32 %v910_v43, %v890_v39  ;;  %v2443_v39 = vld [vmem:[%s1749_s12 + $0x38] sm:$0xff] }
 0x270   : > { %v929_v5 = vadd.f32 %v908_v56, %v889_v12  ;;  %v2446_v12 = vld [vmem:[%s1749_s12 + $0x30] sm:$0xff] }
 0x272   : > { %v914_v16 = vpop.permute.xlu1 %913 }
 0x273   : > { %v912_v57 = vpop.permute.xlu0 %911  ;;  %v932_v23 = vadd.f32 %v914_v16, %v892_v44  ;;  %v2453_v44 = vld [vmem:[%s1749_s12 + $0xb0] sm:$0x1] }
 0x274   : > { %v931_v24 = vadd.f32 %v912_v57, %v891_v14  ;;  %v2460_v14 = vld [vmem:[%s1749_s12 + $0xe0] sm:$0x1] }
 0x276   : > { %v918_v17 = vpop.permute.xlu1 %917 }
 0x277   : > { %v916_v48 = vpop.permute.xlu0 %915  ;;  %v934_v26 = vadd.f32 %v918_v17, %v2332_v15  ;;  %v2467_v15 = vld [vmem:[%s1749_s12 + $0x78] sm:$0xff] }
 0x278   : > { %v933_v19 = vadd.f32 %v916_v48, %v2335_v45  ;;  %v2470_v45 = vld [vmem:[%s1749_s12 + $0x70] sm:$0xff] }
 0x27a   : > { %v938_v2 = vpop.permute.xlu1 %937 }
 0x27b   : > { %v936_v3 = vpop.permute.xlu0 %935  ;;  %v960_v49 = vadd.f32 %v938_v2, %v928_v58 }
 0x27c   : > { %v959_v50 = vadd.f32 %v936_v3, %v927_v59 }
 0x27d   : > { %v2381_v8 = vmul.f32 0.33333334, %v960_v49 }
 0x27e   : > { %v2383_v9 = vmul.f32 0.33333334, %v959_v50  ;;  %v942_v31 = vpop.permute.xlu1 %941 }
 0x27f   : > { %v940_v6 = vpop.permute.xlu0 %939  ;;  %v962_v32 = vadd.f32 %v942_v31, %v930_v55  ;;  %1009 = vrot.lane.b32.xlu1 %v2381_v8, %s1722_s17 }
 0x280   : > { %v961_v22 = vadd.f32 %v940_v6, %v929_v5  ;;  %1007 = vrot.lane.b32.xlu0 %v2383_v9, %s1722_s17 }
 0x281   : > { %v2389_v10 = vmul.f32 0.33333334, %v962_v32 }
 0x282   : > { %v2391_v11 = vmul.f32 0.33333334, %v961_v22  ;;  %v946_v51 = vpop.permute.xlu1 %945 }
 0x283   : > { %v944_v54 = vpop.permute.xlu0 %943  ;;  %v964_v25 = vadd.f32 %v946_v51, %v932_v23  ;;  %1013 = vrot.lane.b32.xlu1 %v2389_v10, %s1722_s17 }
 0x284   : > { %v963_v18 = vadd.f32 %v944_v54, %v931_v24  ;;  %1011 = vrot.lane.b32.xlu0 %v2391_v11, %s1722_s17 }
 0x285   : > { %v2399_v27 = vmul.f32 0.33333334, %v964_v25 }
 0x286   : > { %v2401_v28 = vmul.f32 0.33333334, %v963_v18  ;;  %v950_v36 = vpop.permute.xlu1 %949 }
 0x287   : > { %v948_v60 = vpop.permute.xlu0 %947  ;;  %v966_v61 = vadd.f32 %v950_v36, %v934_v26  ;;  %1017 = vrot.lane.b32.xlu1 %v2399_v27, %s1722_s17 }
 0x288   : > { %v965_v29 = vadd.f32 %v948_v60, %v933_v19  ;;  %1015 = vrot.lane.b32.xlu0 %v2401_v28, %s1722_s17 }
 0x289   : > { %v2407_v34 = vmul.f32 0.33333334, %v966_v61 }
 0x28a   : > { %v2409_v35 = vmul.f32 0.33333334, %v965_v29  ;;  %v978_v46 = vpop.permute.xlu1 %977 }
 0x28b   : > { %1021 = vrot.lane.b32.xlu1 %v2407_v34, %s1722_s17  ;;  %v976_v47 = vpop.permute.xlu0 %975  ;;  %v1032_v56 = vsel %vm285_vm4, %v2381_v8, %v978_v46 }
 0x28c   : > { %1019 = vrot.lane.b32.xlu0 %v2409_v35, %s1722_s17  ;;  %v1031_v16 = vsel %vm285_vm4, %v2383_v9, %v976_v47 }
 0x28e   : > { %v982_v42 = vpop.permute.xlu1 %981 }
 0x28f   : > { %1535 = vrot.lane.b32.xlu1 %v2416_v30, %s1718_s13  ;;  %v980_v52 = vpop.permute.xlu0 %979  ;;  %v1034_v3 = vsel %vm285_vm4, %v2389_v10, %v982_v42 }
 0x290   : > { %1167 = vrot.lane.b32.xlu0 %v2419_v33, %s1718_s13  ;;  %v1033_v49 = vsel %vm285_vm4, %v2391_v11, %v980_v52 }
 0x292   : > { %v986_v53 = vpop.permute.xlu1 %985 }
 0x293   : > { %1537 = vrot.lane.b32.xlu1 %v2426_v7, %s1718_s13  ;;  %v984_v0 = vpop.permute.xlu0 %983  ;;  %v1036_v6 = vsel %vm285_vm4, %v2399_v27, %v986_v53 }
 0x294   : > { %1169 = vrot.lane.b32.xlu0 %v2429_v20, %s1718_s13  ;;  %v1035_v32 = vsel %vm285_vm4, %v2401_v28, %v984_v0 }
 0x296   : > { %v990_v1 = vpop.permute.xlu1 %989 }
 0x297   : > { %1183 = vrot.lane.b32.xlu1 %v2419_v33, %s1719_s14  ;;  %v988_v43 = vpop.permute.xlu0 %987  ;;  %v1038_v54 = vsel %vm285_vm4, %v2407_v34, %v990_v1 }
 0x298   : > { %1075 = vrot.lane.b32.xlu0 %v2436_v38, %s1718_s13  ;;  %v1037_v25 = vsel %vm285_vm4, %v2409_v35, %v988_v43 }
 0x29b   : > { %1273 = vrot.lane.b32.xlu1 %v2443_v39, %s1718_s13 }
 0x29c   : > { %1271 = vrot.lane.b32.xlu0 %v2446_v12, %s1718_s13 }
 0x29f   : > { %1551 = vrot.lane.b32.xlu1 %v2416_v30, %s1719_s14 }
 0x2a0   : > { %1443 = vrot.lane.b32.xlu0 %v2453_v44, %s1718_s13 }
 0x2a3   : > { %1185 = vrot.lane.b32.xlu1 %v2429_v20, %s1719_s14 }
 0x2a4   : > { %1077 = vrot.lane.b32.xlu0 %v2460_v14, %s1718_s13 }
 0x2a7   : > { %1277 = vrot.lane.b32.xlu1 %v2467_v15, %s1718_s13 }
 0x2a8   : > { %1275 = vrot.lane.b32.xlu0 %v2470_v45, %s1718_s13 }
 0x2ab   : > { %1553 = vrot.lane.b32.xlu1 %v2426_v7, %s1719_s14 }
 0x2ac   : > { %1445 = vrot.lane.b32.xlu0 %v2477_v62, %s1718_s13 }
 0x2af   : > { %1279 = vrot.lane.b32.xlu1 %v2484_v63, %s1718_s13 }
 0x2b0   : > { %1091 = vrot.lane.b32.xlu0 %v2436_v38, %s1719_s14 }
 0x2b3   : > { %1303 = vrot.lane.b32.xlu1 %v2446_v12, %s1719_s14 }
 0x2b4   : > { %1281 = vrot.lane.b32.xlu0 %v2491_v13, %s1718_s13 }
 0x2b7   : > { %1459 = vrot.lane.b32.xlu1 %v2453_v44, %s1719_s14 }
 0x2b8   : > { %1305 = vrot.lane.b32.xlu0 %v2443_v39, %s1719_s14 }
 0x2bb   : > { %1283 = vrot.lane.b32.xlu1 %v2502_v40, %s1718_s13 }
 0x2bc   : > { %1093 = vrot.lane.b32.xlu0 %v2460_v14, %s1719_s14 }
 0x2bf   : > { %1307 = vrot.lane.b32.xlu1 %v2470_v45, %s1719_s14 }
 0x2c0   : > { %1285 = vrot.lane.b32.xlu0 %v2509_v41, %s1718_s13 }
 0x2c3   : > { %1461 = vrot.lane.b32.xlu1 %v2477_v62, %s1719_s14 }
 0x2c4   : > { %1309 = vrot.lane.b32.xlu0 %v2467_v15, %s1719_s14 }
 0x2c7   : > { %1313 = vrot.lane.b32.xlu1 %v2491_v13, %s1719_s14 }
 0x2c8   : > { %1311 = vrot.lane.b32.xlu0 %v2484_v63, %s1719_s14 }
 0x2cb   : > { %1317 = vrot.lane.b32.xlu1 %v2509_v41, %s1719_s14 }
 0x2cc   : > { %1315 = vrot.lane.b32.xlu0 %v2502_v40, %s1719_s14 }
 0x2cf   : > { %1343 = vrot.lane.b32.xlu1 %v2446_v12, %s1720_s15 }
 0x2f1   : > { %v1010_v57 = vpop.permute.xlu1 %1009 }
 0x2f2   : > { %v1008_v17 = vpop.permute.xlu0 %1007  ;;  %v1040_v48 = vsel %vm294_vm5, %v1032_v56, %v1010_v57 }
 0x2f3   : > { %v1039_v58 = vsel %vm294_vm5, %v1031_v16, %v1008_v17  ;;  %v1048_v59 = vsel %vm2099_vm7, %v1040_v48, 0.0 }
 0x2f4   : > { %v1047_v2 = vsel %vm2099_vm7, %v1039_v58, 0.0  ;;  %1056 = vst.msk [vmem:[%s1979_s21 + $0x2d] sm:$0xff] %vm315_vm8, %v1048_v59 }
 0x2f5   : > { %1055 = vst.msk [vmem:[%s1979_s21 + $0x25] sm:$0xff] %vm315_vm8, %v1047_v2  ;;  %v1014_v50 = vpop.permute.xlu1 %1013 }
 0x2f6   : > { %v1012_v55 = vpop.permute.xlu0 %1011  ;;  %v1042_v5 = vsel %vm294_vm5, %v1034_v3, %v1014_v50 }
 0x2f7   : > { %v1041_v8 = vsel %vm294_vm5, %v1033_v49, %v1012_v55  ;;  %v1050_v9 = vsel %vm2119_vm10, %v1042_v5, 0.0 }
 0x2f8   : > { %v1049_v31 = vsel %vm2119_vm10, %v1041_v8, 0.0  ;;  %1058 = vst.msk [vmem:[%s1979_s21 + $0x75] sm:$0xff] %vm315_vm8, %v1050_v9 }
 0x2f9   : > { %1057 = vst.msk [vmem:[%s1979_s21 + $0x6d] sm:$0xff] %vm315_vm8, %v1049_v31  ;;  %v1018_v22 = vpop.permute.xlu1 %1017 }
 0x2fa   : > { %v1016_v23 = vpop.permute.xlu0 %1015  ;;  %v1044_v24 = vsel %vm294_vm5, %v1036_v6, %v1018_v22 }
 0x2fb   : > { %v1043_v10 = vsel %vm294_vm5, %v1035_v32, %v1016_v23  ;;  %v1052_v11 = vsel %vm2099_vm7, %v1044_v24, 0.0 }
 0x2fc   : > { %v1051_v51 = vsel %vm2099_vm7, %v1043_v10, 0.0  ;;  %1060 = vst.msk [vmem:[%s1979_s21 + $0xbd] sm:$0xff] %vm315_vm8, %v1052_v11 }
 0x2fd   : > { %1059 = vst.msk [vmem:[%s1979_s21 + $0xb5] sm:$0xff] %vm315_vm8, %v1051_v51  ;;  %v1022_v18 = vpop.permute.xlu1 %1021 }
 0x2fe   : > { %v1020_v26 = vpop.permute.xlu0 %1019  ;;  %v1046_v19 = vsel %vm294_vm5, %v1038_v54, %v1022_v18 }
 0x2ff   : > { %v1045_v27 = vsel %vm294_vm5, %v1037_v25, %v1020_v26  ;;  %v1054_v28 = vsel %vm2119_vm10, %v1046_v19, 0.0 }
 0x300   : > { %v1053_v36 = vsel %vm2119_vm10, %v1045_v27, 0.0  ;;  %1062 = vst.msk [vmem:[%s1979_s21 + $0x105] sm:$0xff] %vm315_vm8, %v1054_v28 }
 0x301   : > { %1061 = vst.msk [vmem:[%s1979_s21 + $0xfd] sm:$0xff] %vm315_vm8, %v1053_v36  ;;  %v1536_v60 = vpop.permute.xlu1 %1535 }
 0x302   : > { %v1168_v61 = vpop.permute.xlu0 %1167  ;;  %v1547_v56 = vsel %vm344_vm1, %v1536_v60, 0.0 }
 0x303   : > { %v1179_v35 = vsel %vm344_vm1, %v1168_v61, 0.0  ;;  %v1567_v16 = vadd.f32 %v1547_v56, %v2416_v30 }
 0x304   : > { %v1199_v46 = vadd.f32 %v1179_v35, %v2419_v33 }
 0x305   : > { %v1538_v29 = vpop.permute.xlu1 %1537 }
 0x306   : > { %v1170_v34 = vpop.permute.xlu0 %1169  ;;  %v1548_v24 = vsel %vm344_vm1, %v1538_v29, 0.0 }
 0x307   : > { %v1180_v48 = vsel %vm344_vm1, %v1170_v34, 0.0  ;;  %v1568_v25 = vadd.f32 %v1548_v24, %v2426_v7 }
 0x308   : > { %v1200_v2 = vadd.f32 %v1180_v48, %v2429_v20 }
 0x309   : > { %v1184_v47 = vpop.permute.xlu1 %1183 }
 0x30a   : > { %v1076_v42 = vpop.permute.xlu0 %1075  ;;  %v1195_v52 = vsel %vm361_vm2, %v1184_v47, 0.0 }
 0x30b   : > { %v1203_v53 = vadd.f32 %v1199_v46, %v1195_v52  ;;  %v1085_v26 = vsel %vm344_vm1, %v1076_v42, 0.0 }
 0x30d   : > { %v1207_v0 = vmul.f32 0.33333334, %v1203_v53  ;;  %v1274_v1 = vpop.permute.xlu1 %1273 }
 0x30e   : > { %v1272_v43 = vpop.permute.xlu0 %1271  ;;  %v1296_v19 = vadd.f32 %v1274_v1, %v2443_v39 }
 0x30f   : > { %1215 = vrot.lane.b32.xlu0 %v1207_v0, %s1720_s15  ;;  %v1295_v10 = vadd.f32 %v1272_v43, %v2446_v12  ;;  %v1105_v12 = vadd.f32 %v1085_v26, %v2436_v38 }
 0x311   : > { %v1552_v57 = vpop.permute.xlu1 %1551 }
 0x312   : > { %v1444_v17 = vpop.permute.xlu0 %1443  ;;  %v1563_v58 = vsel %vm361_vm2, %v1552_v57, 0.0 }
 0x313   : > { %v1571_v59 = vadd.f32 %v1567_v16, %v1563_v58  ;;  %1345 = vrot.lane.b32.xlu0 %v2443_v39, %s1720_s15  ;;  %v1453_v1 = vsel %vm344_vm1, %v1444_v17, 0.0 }
 0x314   : > { %v1473_v57 = vadd.f32 %v1453_v1, %v2453_v44 }
 0x315   : > { %v1575_v3 = vmul.f32 0.33333334, %v1571_v59  ;;  %v1186_v49 = vpop.permute.xlu1 %1185 }
 0x316   : > { %v1078_v50 = vpop.permute.xlu0 %1077  ;;  %v1196_v55 = vsel %vm361_vm2, %v1186_v49, 0.0 }
 0x317   : > { %v1204_v5 = vadd.f32 %v1200_v2, %v1196_v55  ;;  %1583 = vrot.lane.b32.xlu1 %v1575_v3, %s1720_s15 }
 0x319   : > { %v1208_v8 = vmul.f32 0.33333334, %v1204_v5  ;;  %v1278_v9 = vpop.permute.xlu1 %1277 }
 0x31a   : > { %v1276_v31 = vpop.permute.xlu0 %1275  ;;  %v1298_v48 = vadd.f32 %v1278_v9, %v2467_v15 }
 0x31b   : > { %1227 = vrot.lane.b32.xlu1 %v2419_v33, %s1721_s16  ;;  %1217 = vrot.lane.b32.xlu0 %v1208_v8, %s1720_s15  ;;  %v1297_v0 = vadd.f32 %v1276_v31, %v2470_v45 }
 0x31d   : > { %v1554_v6 = vpop.permute.xlu1 %1553 }
 0x31e   : > { %v1446_v32 = vpop.permute.xlu0 %1445  ;;  %v1564_v11 = vsel %vm361_vm2, %v1554_v6, 0.0 }
 0x31f   : > { %1349 = vrot.lane.b32.xlu1 %v2467_v15, %s1720_s15  ;;  %1347 = vrot.lane.b32.xlu0 %v2470_v45, %s1720_s15  ;;  %v1572_v27 = vadd.f32 %v1568_v25, %v1564_v11  ;;  %v1086_v45 = vsel %vm344_vm1, %v1078_v50, 0.0  ;;  %v1454_v31 = vsel %vm344_vm1, %v1446_v32, 0.0 }
 0x320   : > { %v1106_v3 = vadd.f32 %v1086_v45, %v2460_v14 }
 0x321   : > { %v1280_v22 = vpop.permute.xlu1 %1279  ;;  %v1576_v34 = vmul.f32 0.33333334, %v1572_v27 }
 0x322   : > { %v1092_v23 = vpop.permute.xlu0 %1091  ;;  %v1299_v9 = vadd.f32 %v1280_v22, %v2484_v63 }
 0x323   : > { %v1101_v36 = vsel %vm361_vm2, %v1092_v23, 0.0 }
 0x324   : > { %v1109_v35 = vadd.f32 %v1105_v12, %v1101_v36 }
 0x325   : > { %v1304_v51 = vpop.permute.xlu1 %1303 }
 0x326   : > { %v1282_v54 = vpop.permute.xlu0 %1281  ;;  %v1327_v18 = vadd.f32 %v1304_v51, %v1295_v10  ;;  %v1113_v39 = vmul.f32 0.33333334, %v1109_v35  ;;  %v1474_v10 = vadd.f32 %v1454_v31, %v2477_v62 }
 0x327   : > { %v1300_v11 = vadd.f32 %v1282_v54, %v2491_v13 }
 0x328   : > { %v2611_v28 = vmul.f32 0.33333334, %v1327_v18 }
 0x329   : > { %v1460_v60 = vpop.permute.xlu1 %1459 }
 0x32a   : > { %v1306_v61 = vpop.permute.xlu0 %1305  ;;  %1375 = vrot.lane.b32.xlu0 %v2611_v28, %s1722_s17  ;;  %v1469_v56 = vsel %vm361_vm2, %v1460_v60, 0.0 }
 0x32b   : > { %v1328_v29 = vadd.f32 %v1306_v61, %v1296_v19  ;;  %v1477_v58 = vadd.f32 %v1473_v57, %v1469_v56 }
 0x32d   : > { %v2617_v46 = vmul.f32 0.33333334, %v1328_v29  ;;  %v1284_v47 = vpop.permute.xlu1 %1283  ;;  %v1481_v15 = vmul.f32 0.33333334, %v1477_v58 }
 0x32e   : > { %v1094_v42 = vpop.permute.xlu0 %1093  ;;  %1585 = vrot.lane.b32.xlu0 %v1576_v34, %s1720_s15  ;;  %v1301_v18 = vadd.f32 %v1284_v47, %v2502_v40 }
 0x32f   : > { %1377 = vrot.lane.b32.xlu1 %v2617_v46, %s1722_s17  ;;  %v1102_v2 = vsel %vm361_vm2, %v1094_v42, 0.0 }
 0x330   : > { %v1110_v49 = vadd.f32 %v1106_v3, %v1102_v2 }
 0x331   : > { %v1308_v52 = vpop.permute.xlu1 %1307 }
 0x332   : > { %v1286_v53 = vpop.permute.xlu0 %1285  ;;  %1123 = vrot.lane.b32.xlu0 %v1113_v39, %s1720_s15  ;;  %v1329_v43 = vadd.f32 %v1308_v52, %v1297_v0  ;;  %v1114_v5 = vmul.f32 0.33333334, %v1110_v49 }
 0x333   : > { %1595 = vrot.lane.b32.xlu1 %v2416_v30, %s1721_s16  ;;  %v1302_v26 = vadd.f32 %v1286_v53, %v2509_v41 }
 0x334   : > { %v2635_v59 = vmul.f32 0.33333334, %v1329_v43 }
 0x335   : > { %v1462_v50 = vpop.permute.xlu1 %1461 }
 0x336   : > { %v1310_v16 = vpop.permute.xlu0 %1309  ;;  %1351 = vrot.lane.b32.xlu0 %v2484_v63, %s1720_s15  ;;  %v1470_v23 = vsel %vm361_vm2, %v1462_v50, 0.0 }
 0x337   : > { %1229 = vrot.lane.b32.xlu1 %v2429_v20, %s1721_s16  ;;  %v1330_v17 = vadd.f32 %v1310_v16, %v1298_v48  ;;  %v1478_v63 = vadd.f32 %v1474_v10, %v1470_v23 }
 0x339   : > { %v2643_v55 = vmul.f32 0.33333334, %v1330_v17  ;;  %v1314_v24 = vpop.permute.xlu1 %1313  ;;  %v1482_v32 = vmul.f32 0.33333334, %v1478_v63 }
 0x33a   : > { %1379 = vrot.lane.b32.xlu0 %v2635_v59, %s1722_s17  ;;  %v1312_v8 = vpop.permute.xlu0 %1311  ;;  %v1332_v22 = vadd.f32 %v1314_v24, %v1300_v11 }
 0x33b   : > { %1353 = vrot.lane.b32.xlu1 %v2491_v13, %s1720_s15  ;;  %v1331_v6 = vadd.f32 %v1312_v8, %v1299_v9 }
 0x33c   : > { %v2666_v25 = vmul.f32 0.33333334, %v1332_v22 }
 0x33d   : > { %v2660_v51 = vmul.f32 0.33333334, %v1331_v6  ;;  %v1318_v13 = vpop.permute.xlu1 %1317 }
 0x33e   : > { %1491 = vrot.lane.b32.xlu0 %v1481_v15, %s1720_s15  ;;  %v1316_v54 = vpop.permute.xlu0 %1315  ;;  %v1334_v19 = vadd.f32 %v1318_v13, %v1302_v26 }
 0x33f   : > { %1381 = vrot.lane.b32.xlu1 %v2643_v55, %s1722_s17  ;;  %v1333_v27 = vadd.f32 %v1316_v54, %v1301_v18 }
 0x340   : > { %v2677_v36 = vmul.f32 0.33333334, %v1334_v19 }
 0x341   : > { %v2679_v60 = vmul.f32 0.33333334, %v1333_v27 }
 0x342   : > { %1125 = vrot.lane.b32.xlu0 %v1114_v5, %s1720_s15 }
 0x343   : > { %1597 = vrot.lane.b32.xlu1 %v2426_v7, %s1721_s16 }
 0x346   : > { %1355 = vrot.lane.b32.xlu0 %v2502_v40, %s1720_s15  ;;  %v1344_v40 = vpop.permute.xlu1 %1343 }
 0x347   : > { %1135 = vrot.lane.b32.xlu1 %v2436_v38, %s1721_s16  ;;  %v1399_v52 = vsel %vm285_vm4, %v2611_v28, %v1344_v40 }
 0x34a   : > { %1383 = vrot.lane.b32.xlu0 %v2660_v51, %s1722_s17 }
 0x34b   : > { %1357 = vrot.lane.b32.xlu1 %v2509_v41, %s1720_s15 }
 0x34e   : > { %1493 = vrot.lane.b32.xlu0 %v1482_v32, %s1720_s15 }
 0x34f   : > { %1385 = vrot.lane.b32.xlu1 %v2666_v25, %s1722_s17 }
 0x352   : > { %1137 = vrot.lane.b32.xlu0 %v2460_v14, %s1721_s16 }
 0x353   : > { %1503 = vrot.lane.b32.xlu1 %v2453_v44, %s1721_s16 }
 0x356   : > { %1389 = vrot.lane.b32.xlu0 %v2677_v36, %s1722_s17 }
 0x357   : > { %1387 = vrot.lane.b32.xlu1 %v2679_v60, %s1722_s17 }
 0x35b   : > { %1505 = vrot.lane.b32.xlu1 %v2477_v62, %s1721_s16 }
 0x381   : > { %v1216_v41 = vpop.permute.xlu0 %1215 }
 0x382   : > { %v1239_v12 = vsel %vm285_vm4, %v2419_v33, %v1216_v41 }
 0x385   : > { %v1346_v34 = vpop.permute.xlu0 %1345 }
 0x386   : > { %v1400_v43 = vsel %vm285_vm4, %v2617_v46, %v1346_v34 }
 0x389   : > { %v1584_v61 = vpop.permute.xlu1 %1583 }
 0x38a   : > { %v1607_v48 = vsel %vm285_vm4, %v2416_v30, %v1584_v61 }
 0x38d   : > { %v1228_v29 = vpop.permute.xlu1 %1227  ;;  %v1218_v42 = vpop.permute.xlu0 %1217 }
 0x38e   : > { %v1243_v35 = vsel %vm294_vm5, %v1239_v12, %v1228_v29  ;;  %v1240_v2 = vsel %vm285_vm4, %v2429_v20, %v1218_v42 }
 0x38f   : > { %v1247_v47 = vsel %vm2099_vm7, %v1243_v35, 0.0 }
 0x390   : > { %1251 = vst.msk [vmem:[%s1979_s21 + $0x35] sm:$0x1] %vm418_vm0, %v1247_v47 }
 0x391   : > { %v1348_v39 = vpop.permute.xlu0 %1347  ;;  %v1350_v53 = vpop.permute.xlu1 %1349 }
 0x392   : > { %v1401_v50 = vsel %vm285_vm4, %v2635_v59, %v1348_v39  ;;  %v1402_v59 = vsel %vm285_vm4, %v2643_v55, %v1350_v53 }
 0x39c   : > { %v1376_v0 = vpop.permute.xlu0 %1375 }
 0x39d   : > { %v1407_v33 = vsel %vm294_vm5, %v1399_v52, %v1376_v0 }
 0x39e   : > { %v1415_v1 = vsel %vm2099_vm7, %v1407_v33, 0.0 }
 0x39f   : > { %1423 = vst.msk [vmem:[%s1979_s21 + $0x37] sm:$0xff] %vm315_vm8, %v1415_v1 }
 0x3a0   : > { %v1586_v16 = vpop.permute.xlu0 %1585 }
 0x3a1   : > { %v1378_v56 = vpop.permute.xlu1 %1377  ;;  %v1608_v10 = vsel %vm285_vm4, %v2426_v7, %v1586_v16 }
 0x3a2   : > { %v1408_v57 = vsel %vm294_vm5, %v1400_v43, %v1378_v56 }
 0x3a3   : > { %v1416_v28 = vsel %vm2099_vm7, %v1408_v57, 0.0 }
 0x3a4   : > { %1424 = vst.msk [vmem:[%s1979_s21 + $0x3f] sm:$0xff] %vm315_vm8, %v1416_v28  ;;  %v1124_v58 = vpop.permute.xlu0 %1123 }
 0x3a5   : > { %v1596_v45 = vpop.permute.xlu1 %1595  ;;  %v1145_v32 = vsel %vm285_vm4, %v2436_v38, %v1124_v58 }
 0x3a6   : > { %v1611_v17 = vsel %vm294_vm5, %v1607_v48, %v1596_v45 }
 0x3a7   : > { %v1615_v46 = vsel %vm2099_vm7, %v1611_v17, 0.0 }
 0x3a8   : > { %1619 = vst.msk [vmem:[%s1979_s21 + $0x47] sm:$0x1] %vm418_vm0, %v1615_v46  ;;  %v1352_v15 = vpop.permute.xlu0 %1351 }
 0x3a9   : > { %v1230_v3 = vpop.permute.xlu1 %1229  ;;  %v1403_v26 = vsel %vm285_vm4, %v2660_v51, %v1352_v15 }
 0x3aa   : > { %v1244_v49 = vsel %vm294_vm5, %v1240_v2, %v1230_v3 }
 0x3ab   : > { %v1248_v30 = vsel %vm2119_vm10, %v1244_v49, 0.0 }
 0x3ac   : > { %1252 = vst.msk [vmem:[%s1979_s21 + $0x7d] sm:$0x1] %vm418_vm0, %v1248_v30  ;;  %v1380_v8 = vpop.permute.xlu0 %1379 }
 0x3ad   : > { %v1354_v5 = vpop.permute.xlu1 %1353  ;;  %v1409_v20 = vsel %vm294_vm5, %v1401_v50, %v1380_v8 }
 0x3ae   : > { %v1417_v9 = vsel %vm2119_vm10, %v1409_v20, 0.0  ;;  %v1404_v4 = vsel %vm285_vm4, %v2666_v25, %v1354_v5 }
 0x3af   : > { %1425 = vst.msk [vmem:[%s1979_s21 + $0x7f] sm:$0xff] %vm315_vm8, %v1417_v9 }
 0x3b0   : > { %v1492_v6 = vpop.permute.xlu0 %1491 }
 0x3b1   : > { %v1382_v31 = vpop.permute.xlu1 %1381  ;;  %v1513_v29 = vsel %vm285_vm4, %v2453_v44, %v1492_v6 }
 0x3b2   : > { %v1410_v23 = vsel %vm294_vm5, %v1402_v59, %v1382_v31 }
 0x3b3   : > { %v1418_v24 = vsel %vm2119_vm10, %v1410_v23, 0.0 }
 0x3b4   : > { %1426 = vst.msk [vmem:[%s1979_s21 + $0x87] sm:$0xff] %vm315_vm8, %v1418_v24  ;;  %v1126_v63 = vpop.permute.xlu0 %1125 }
 0x3b5   : > { %v1598_v11 = vpop.permute.xlu1 %1597  ;;  %v1146_v34 = vsel %vm285_vm4, %v2460_v14, %v1126_v63 }
 0x3b6   : > { %v1612_v22 = vsel %vm294_vm5, %v1608_v10, %v1598_v11 }
 0x3b7   : > { %v1616_v55 = vsel %vm2119_vm10, %v1612_v22, 0.0 }
 0x3b8   : > { %1620 = vst.msk [vmem:[%s1979_s21 + $0x8f] sm:$0x1] %vm418_vm0, %v1616_v55  ;;  %v1356_v54 = vpop.permute.xlu0 %1355 }
 0x3b9   : > { %v1136_v13 = vpop.permute.xlu1 %1135  ;;  %v1405_v44 = vsel %vm285_vm4, %v2679_v60, %v1356_v54 }
 0x3ba   : > { %v1149_v7 = vsel %vm294_vm5, %v1145_v32, %v1136_v13 }
 0x3bb   : > { %v1153_v18 = vsel %vm2099_vm7, %v1149_v7, 0.0 }
 0x3bc   : > { %1157 = vst.msk [vmem:[%s1979_s21 + $0xb4] sm:$0x1] %vm418_vm0, %v1153_v18  ;;  %v1384_v19 = vpop.permute.xlu0 %1383 }
 0x3bd   : > { %v1358_v38 = vpop.permute.xlu1 %1357  ;;  %v1411_v27 = vsel %vm294_vm5, %v1403_v26, %v1384_v19 }
 0x3be   : > { %v1419_v40 = vsel %vm2099_vm7, %v1411_v27, 0.0  ;;  %v1406_v14 = vsel %vm285_vm4, %v2677_v36, %v1358_v38 }
 0x3bf   : > { %1427 = vst.msk [vmem:[%s1979_s21 + $0xc7] sm:$0xff] %vm315_vm8, %v1419_v40 }
 0x3c0   : > { %v1494_v61 = vpop.permute.xlu0 %1493 }
 0x3c1   : > { %v1386_v41 = vpop.permute.xlu1 %1385  ;;  %v1514_v60 = vsel %vm285_vm4, %v2477_v62, %v1494_v61 }
 0x3c2   : > { %v1412_v12 = vsel %vm294_vm5, %v1404_v4, %v1386_v41 }
 0x3c3   : > { %v1420_v51 = vsel %vm2099_vm7, %v1412_v12, 0.0 }
 0x3c4   : > { %1428 = vst.msk [vmem:[%s1979_s21 + $0xcf] sm:$0xff] %vm315_vm8, %v1420_v51  ;;  %v1138_v47 = vpop.permute.xlu0 %1137 }
 0x3c5   : > { %v1504_v35 = vpop.permute.xlu1 %1503  ;;  %v1150_v42 = vsel %vm294_vm5, %v1146_v34, %v1138_v47 }
 0x3c6   : > { %v1517_v25 = vsel %vm294_vm5, %v1513_v29, %v1504_v35  ;;  %v1154_v52 = vsel %vm2119_vm10, %v1150_v42, 0.0 }
 0x3c7   : > { %v1521_v39 = vsel %vm2099_vm7, %v1517_v25, 0.0  ;;  %1158 = vst.msk [vmem:[%s1979_s21 + $0xfc] sm:$0x1] %vm418_vm0, %v1154_v52 }
 0x3c8   : > { %1525 = vst.msk [vmem:[%s1979_s21 + $0xc6] sm:$0x1] %vm418_vm0, %v1521_v39  ;;  %v1390_v0 = vpop.permute.xlu0 %1389 }
 0x3c9   : > { %v1388_v53 = vpop.permute.xlu1 %1387  ;;  %v1414_v21 = vsel %vm294_vm5, %v1406_v14, %v1390_v0 }
 0x3ca   : > { %v1413_v33 = vsel %vm294_vm5, %v1405_v44, %v1388_v53  ;;  %v1422_v43 = vsel %vm2119_vm10, %v1414_v21, 0.0 }
 0x3cb   : > { %v1421_v1 = vsel %vm2119_vm10, %v1413_v33, 0.0  ;;  %1430 = vst.msk [vmem:[%s1979_s21 + $0x117] sm:$0xff] %vm315_vm8, %v1422_v43 }
 0x3cc   : > { %1429 = vst.msk [vmem:[%s1979_s21 + $0x10f] sm:$0xff] %vm315_vm8, %v1421_v1 }
 0x3cd   : > { %v1506_v36 = vpop.permute.xlu1 %1505 }
 0x3ce   : > { %v1518_v56 = vsel %vm294_vm5, %v1514_v60, %v1506_v36 }
 0x3cf   : > { %v1522_v16 = vsel %vm2119_vm10, %v1518_v56, 0.0 }
 0x3d0   : > { %1526 = vst.msk [vmem:[%s1979_s21 + $0x10e] sm:$0x1] %vm418_vm0, %v1522_v16 }
 0x3d1 PF: > { %s11_s6 = sadd.s32 1, %s1716_s6  }
 0x3d2   : > { %p8_p4 = scmp.ge.s32.totalorder %s11_s6, 4  }
 0x3d4   :  { %10 = sbr.rel (!%p8_p4) target bundleno = 1 (0x1), region = 54 }

</bundles_post_ra>
